<compile_context>
chip_gen: v6e
topology: v6e:2x2x1
jax: 0.10.0
libtpu: 0.0.40
codegen_flags: <defaults>
</compile_context>

<pallas_src>
import functools

import jax
import jax.numpy as jnp
from jax import lax
from jax.experimental import pallas as pl
from jax.experimental.pallas import tpu as pltpu

# ----------------------------- model config ---------------------------------
MAX_SEQ_LENGTH = 512
VOCAB_SIZE = 100          # len(string.printable)
EMBED_DIM = 32
NUM_HEADS = 4
HIDDEN_DIM = 64
NUM_LAYERS = 2
LN_EPS = 1e-5             # nn.LayerNorm default
NEG_INF = -1e30           # finite "-inf" for the causal mask (no inf arithmetic)


# ----------------------------- in-kernel math --------------------------------
def _erf_f32(x):
  # float32-accurate erf (Abramowitz & Stegun 7.1.26, |err| < 1.5e-7) built from
  # Mosaic-supported ops; used for PyTorch's exact GELU.
  a1, a2, a3, a4, a5 = 0.254829592, -0.284496736, 1.421413741, -1.453152027, 1.061405429
  p = 0.3275911
  ax = jnp.abs(x)
  t = 1.0 / (1.0 + p * ax)
  poly = ((((a5 * t + a4) * t + a3) * t + a2) * t + a1) * t
  y = 1.0 - poly * jnp.exp(-ax * ax)
  return jnp.where(x >= 0.0, y, -y)


def _gelu_exact(x):
  # Matches F.gelu(x, approximate='none') = 0.5 * x * (1 + erf(x / sqrt(2)))
  return 0.5 * x * (1.0 + _erf_f32(x * 0.7071067811865476))


def _layer_norm(x, w, b):
  mu = jnp.mean(x, axis=-1, keepdims=True)
  var = jnp.mean(jnp.square(x - mu), axis=-1, keepdims=True)
  return (x - mu) * lax.rsqrt(var + LN_EPS) * w + b


# ----------------------------- fused Pallas kernel ---------------------------
def gpt_fused_kernel(x_ref,
                     in_w_ref, in_b_ref, out_w_ref, out_b_ref,
                     ff1_w_ref, ff1_b_ref, ff2_w_ref, ff2_b_ref,
                     ln1_w_ref, ln1_b_ref, ln2_w_ref, ln2_b_ref,
                     fc_w_ref, fc_b_ref,
                     o_ref, ctx_ref,
                     *, num_heads, num_layers):
  """Full SimpleGPT forward for one batch block: L encoder layers + fc_out."""
  Bb, S, E = x_ref.shape
  Dh = E // num_heads
  scale = 1.0 / (Dh ** 0.5)

  # Causal mask built in-kernel: large finite negative above the diagonal.
  row = lax.broadcasted_iota(jnp.int32, (S, S), 0)
  col = lax.broadcasted_iota(jnp.int32, (S, S), 1)
  mask = jnp.where(col > row, jnp.float32(NEG_INF), jnp.float32(0.0))[None, :, :]

  x = x_ref[...].astype(jnp.float32)                      # (Bb, S, E)

  for l in range(num_layers):                             # static unroll
    xf = x.reshape(Bb * S, E)

    # --- QKV projection (weights pre-transposed to (E, 3E)) ---
    qkv = jnp.dot(xf, in_w_ref[l], preferred_element_type=jnp.float32) + in_b_ref[l]
    q = (qkv[:, :E] * scale).reshape(Bb, S, E)
    k = qkv[:, E:2 * E].reshape(Bb, S, E)
    v = qkv[:, 2 * E:].reshape(Bb, S, E)

    # --- per-head attention, batched over the batch dim; head contexts are
    #     written into VMEM scratch so the out-projection is one matmul ---
    for h in range(num_heads):                            # static unroll
      sl = slice(h * Dh, (h + 1) * Dh)
      s = jnp.einsum('bqd,bkd->bqk', q[:, :, sl], k[:, :, sl],
                     preferred_element_type=jnp.float32) + mask
      s = s - jnp.max(s, axis=-1, keepdims=True)
      p = jnp.exp(s)
      p = p * pl.reciprocal(jnp.sum(p, axis=-1, keepdims=True), approx=True)
      ctx_ref[:, :, sl] = jnp.einsum('bqk,bkd->bqd', p, v[:, :, sl],
                                     preferred_element_type=jnp.float32)

    ctx = ctx_ref[...].reshape(Bb * S, E)
    attn = jnp.dot(ctx, out_w_ref[l], preferred_element_type=jnp.float32) + out_b_ref[l]

    # --- residual + LayerNorm 1 ---
    x1 = _layer_norm(xf + attn, ln1_w_ref[l], ln1_b_ref[l])

    # --- feed-forward (Linear -> GELU -> Linear) ---
    h1 = jnp.dot(x1, ff1_w_ref[l], preferred_element_type=jnp.float32) + ff1_b_ref[l]
    h1 = _gelu_exact(h1)
    ff = jnp.dot(h1, ff2_w_ref[l], preferred_element_type=jnp.float32) + ff2_b_ref[l]

    # --- residual + LayerNorm 2 ---
    x = _layer_norm(x1 + ff, ln2_w_ref[l], ln2_b_ref[l]).reshape(Bb, S, E)

  # --- final vocab projection (padded to 128 lanes -> lane-dense store) ---
  logits = (jnp.dot(x.reshape(Bb * S, E), fc_w_ref[...],
                    preferred_element_type=jnp.float32) + fc_b_ref[...])
  o_ref[...] = logits.reshape(Bb, S, -1).astype(o_ref.dtype)


# ----------------------------- wrappers ---------------------------------------
_STACKED = ("in_w", "in_b", "out_w", "out_b", "ff1_w", "ff1_b",
            "ff2_w", "ff2_b", "ln1_w", "ln1_b", "ln2_w", "ln2_b")
_TRANSPOSED = ("in_w", "out_w", "ff1_w", "ff2_w")
_WEIGHT_ORDER = _STACKED + ("fc_w", "fc_b")


def _prepare_params(params):
  """Stack per-layer weights, pre-transpose linears to (in,out), pad vocab to 128."""
  layers = params["layers"]
  pp = {}
  for name in _STACKED:
    arrs = [lp[name] for lp in layers]
    if name in _TRANSPOSED:
      arrs = [a.T for a in arrs]
    pp[name] = jnp.stack(arrs, axis=0).astype(jnp.float32)
  V, E = params["fc_w"].shape
  v_pad = ((V + 127) // 128) * 128
  pp["fc_w"] = jnp.zeros((E, v_pad), jnp.float32).at[:, :V].set(params["fc_w"].T)
  pp["fc_b"] = jnp.zeros((1, v_pad), jnp.float32).at[:, :V].set(params["fc_b"])
  return pp


def _const_spec(arr):
  # Full-array block (block_shape == array shape -> no (8,128) constraint).
  n = arr.ndim
  return pl.BlockSpec(arr.shape, lambda b, _n=n: (0,) * _n)


@jax.jit
def simple_gpt_forward(tokens, params):
  """tokens: (B, S) int32 -> logits (B, S, VOCAB_SIZE) float32."""
  B, S = tokens.shape
  E = EMBED_DIM
  V = params["fc_w"].shape[0]

  # Embedding gathers = glue (stay in plain JAX).
  positions = jnp.minimum(jnp.arange(S), MAX_SEQ_LENGTH - 1)
  x = (params["embed"][tokens] + params["pos_embed"][positions][None, :, :]
       ).astype(jnp.float32)

  pp = _prepare_params(params)
  v_pad = pp["fc_w"].shape[1]

  Bb = B                              # whole batch per grid step (fits VMEM easily)
  assert B % Bb == 0

  kernel = functools.partial(gpt_fused_kernel,
                             num_heads=NUM_HEADS, num_layers=NUM_LAYERS)
  logits_pad = pl.pallas_call(
      kernel,
      out_shape=jax.ShapeDtypeStruct((B, S, v_pad), jnp.float32),
      grid=(B // Bb,),
      in_specs=[pl.BlockSpec((Bb, S, E), lambda b: (b, 0, 0))]
               + [_const_spec(pp[k]) for k in _WEIGHT_ORDER],
      out_specs=pl.BlockSpec((Bb, S, v_pad), lambda b: (b, 0, 0)),
      scratch_shapes=[pltpu.VMEM((Bb, S, E), jnp.float32)],
      compiler_params=pltpu.CompilerParams(dimension_semantics=("parallel",)),
  )(x, *[pp[k] for k in _WEIGHT_ORDER])

  return logits_pad[..., :V]


# ----------------------------- parameter init ---------------------------------
def _linear_init(key, out_f, in_f):
  bound = 1.0 / (in_f ** 0.5)
  kw, kb = jax.random.split(key)
  w = jax.random.uniform(kw, (out_f, in_f), jnp.float32, -bound, bound)
  b = jax.random.uniform(kb, (1, out_f), jnp.float32, -bound, bound)
  return w, b


def _layer_init(key):
  k1, k2, k3, k4 = jax.random.split(key, 4)
  in_w, in_b = _linear_init(k1, 3 * EMBED_DIM, EMBED_DIM)
  out_w, out_b = _linear_init(k2, EMBED_DIM, EMBED_DIM)
  ff1_w, ff1_b = _linear_init(k3, HIDDEN_DIM, EMBED_DIM)
  ff2_w, ff2_b = _linear_init(k4, EMBED_DIM, HIDDEN_DIM)
  return dict(
      in_w=in_w, in_b=in_b, out_w=out_w, out_b=out_b,
      ff1_w=ff1_w, ff1_b=ff1_b, ff2_w=ff2_w, ff2_b=ff2_b,
      ln1_w=jnp.ones((1, EMBED_DIM), jnp.float32),
      ln1_b=jnp.zeros((1, EMBED_DIM), jnp.float32),
      ln2_w=jnp.ones((1, EMBED_DIM), jnp.float32),
      ln2_b=jnp.zeros((1, EMBED_DIM), jnp.float32),
  )


def init_params(key):
  ke, kp, kf, *kl = jax.random.split(key, 3 + NUM_LAYERS)
  fc_w, fc_b = _linear_init(kf, VOCAB_SIZE, EMBED_DIM)
  return dict(
      embed=0.02 * jax.random.normal(ke, (VOCAB_SIZE, EMBED_DIM), jnp.float32),
      pos_embed=0.02 * jax.random.normal(kp, (MAX_SEQ_LENGTH, EMBED_DIM), jnp.float32),
      layers=[_layer_init(k) for k in kl],
      fc_w=fc_w, fc_b=fc_b,
  )


# ----------------------------- main -------------------------------------------
if __name__ == "__main__":
  key = jax.random.PRNGKey(0)
  pkey, tkey = jax.random.split(key)
  params = init_params(pkey)

  B, S = 2, 8
  tokens = jax.random.randint(tkey, (B, S), 0, VOCAB_SIZE, dtype=jnp.int32)

  logits = simple_gpt_forward(tokens, params)
  logits = jax.block_until_ready(logits)
  assert logits.shape == (B, S, VOCAB_SIZE), logits.shape
  assert bool(jnp.all(jnp.isfinite(logits)))
  print("KERNEL_OK")
</pallas_src>

<mosaic_0001>
module attributes {stable_mosaic.version = 11 : i64} {
  func.func @gpt_fused_kernel(%arg0: i32, %arg1: memref<2x8x32xf32, #tpu.memory_space<vmem>>, %arg2: memref<2x32x96xf32, #tpu.memory_space<vmem>>, %arg3: memref<2x1x96xf32, #tpu.memory_space<vmem>>, %arg4: memref<2x32x32xf32, #tpu.memory_space<vmem>>, %arg5: memref<2x1x32xf32, #tpu.memory_space<vmem>>, %arg6: memref<2x32x64xf32, #tpu.memory_space<vmem>>, %arg7: memref<2x1x64xf32, #tpu.memory_space<vmem>>, %arg8: memref<2x64x32xf32, #tpu.memory_space<vmem>>, %arg9: memref<2x1x32xf32, #tpu.memory_space<vmem>>, %arg10: memref<2x1x32xf32, #tpu.memory_space<vmem>>, %arg11: memref<2x1x32xf32, #tpu.memory_space<vmem>>, %arg12: memref<2x1x32xf32, #tpu.memory_space<vmem>>, %arg13: memref<2x1x32xf32, #tpu.memory_space<vmem>>, %arg14: memref<32x128xf32, #tpu.memory_space<vmem>>, %arg15: memref<1x128xf32, #tpu.memory_space<vmem>>, %arg16: memref<2x8x128xf32, #tpu.memory_space<vmem>>, %arg17: memref<2x8x32xf32, #tpu.memory_space<vmem>>) attributes {dimension_semantics = [#tpu.dimension_semantics<parallel>], iteration_bounds = array<i64: 1>, scalar_prefetch = 0 : i64, scratch_operands = 1 : i64, tpu.core_type = #tpu.core_type<tc>, window_params = [{transform_indices = @transform_0, window_bounds = array<i64: 2, 8, 32>}, {pipeline_mode = #tpu.pipeline_mode<synchronous>, transform_indices = @transform_1, window_bounds = array<i64: 2, 32, 96>}, {pipeline_mode = #tpu.pipeline_mode<synchronous>, transform_indices = @transform_2, window_bounds = array<i64: 2, 1, 96>}, {pipeline_mode = #tpu.pipeline_mode<synchronous>, transform_indices = @transform_3, window_bounds = array<i64: 2, 32, 32>}, {pipeline_mode = #tpu.pipeline_mode<synchronous>, transform_indices = @transform_4, window_bounds = array<i64: 2, 1, 32>}, {pipeline_mode = #tpu.pipeline_mode<synchronous>, transform_indices = @transform_5, window_bounds = array<i64: 2, 32, 64>}, {pipeline_mode = #tpu.pipeline_mode<synchronous>, transform_indices = @transform_6, window_bounds = array<i64: 2, 1, 64>}, {pipeline_mode = #tpu.pipeline_mode<synchronous>, transform_indices = @transform_7, window_bounds = array<i64: 2, 64, 32>}, {pipeline_mode = #tpu.pipeline_mode<synchronous>, transform_indices = @transform_8, window_bounds = array<i64: 2, 1, 32>}, {pipeline_mode = #tpu.pipeline_mode<synchronous>, transform_indices = @transform_9, window_bounds = array<i64: 2, 1, 32>}, {pipeline_mode = #tpu.pipeline_mode<synchronous>, transform_indices = @transform_10, window_bounds = array<i64: 2, 1, 32>}, {pipeline_mode = #tpu.pipeline_mode<synchronous>, transform_indices = @transform_11, window_bounds = array<i64: 2, 1, 32>}, {pipeline_mode = #tpu.pipeline_mode<synchronous>, transform_indices = @transform_12, window_bounds = array<i64: 2, 1, 32>}, {pipeline_mode = #tpu.pipeline_mode<synchronous>, transform_indices = @transform_13, window_bounds = array<i64: 32, 128>}, {pipeline_mode = #tpu.pipeline_mode<synchronous>, transform_indices = @transform_14, window_bounds = array<i64: 1, 128>}, {transform_indices = @transform_15, window_bounds = array<i64: 2, 8, 128>}]} {
    %0 = tpu.iota {dimensions = array<i32: 0>} : vector<8x8xi32>
    %1 = tpu.iota {dimensions = array<i32: 1>} : vector<8x8xi32>
    %2 = arith.cmpi sgt, %1, %0 : vector<8x8xi32>
    %cst = arith.constant -1.000000e+30 : f32
    %cst_0 = arith.constant 0.000000e+00 : f32
    %3 = vector.broadcast %cst : f32 to vector<8x8xf32>
    %4 = vector.broadcast %cst_0 : f32 to vector<8x8xf32>
    %5 = arith.select %2, %3, %4 : vector<8x8xi1>, vector<8x8xf32>
    %6 = vector.shape_cast %5 : vector<8x8xf32> to vector<1x8x8xf32>
    %c0 = arith.constant 0 : index
    %c0_1 = arith.constant 0 : index
    %c0_2 = arith.constant 0 : index
    %7 = vector.load %arg1[%c0, %c0_1, %c0_2] : memref<2x8x32xf32, #tpu.memory_space<vmem>>, vector<2x8x32xf32>
    %8 = vector.shape_cast %7 : vector<2x8x32xf32> to vector<16x32xf32>
    %c0_3 = arith.constant 0 : index
    %c0_4 = arith.constant 0 : index
    %c0_5 = arith.constant 0 : index
    %9 = vector.load %arg2[%c0_3, %c0_4, %c0_5] : memref<2x32x96xf32, #tpu.memory_space<vmem>>, vector<1x32x96xf32>
    %10 = vector.shape_cast %9 : vector<1x32x96xf32> to vector<32x96xf32>
    %cst_6 = arith.constant dense<0.000000e+00> : vector<16x96xf32>
    %11 = tpu.matmul %8, %10, %cst_6 {dimension_numbers = #tpu.dot_dimension_numbers<[1], [0], [0], [1], [0, 0, 1, 1], [], []>} : vector<16x32xf32>, vector<32x96xf32>, vector<16x96xf32> -> vector<16x96xf32>
    %c0_7 = arith.constant 0 : index
    %c0_8 = arith.constant 0 : index
    %c0_9 = arith.constant 0 : index
    %12 = vector.load %arg3[%c0_7, %c0_8, %c0_9] : memref<2x1x96xf32, #tpu.memory_space<vmem>>, vector<1x1x96xf32>
    %13 = vector.shape_cast %12 : vector<1x1x96xf32> to vector<1x96xf32>
    %14 = vector.broadcast %13 : vector<1x96xf32> to vector<16x96xf32>
    %15 = arith.addf %11, %14 : vector<16x96xf32>
    %16 = vector.extract_strided_slice %15 {offsets = [0, 0], sizes = [16, 32], strides = [1, 1]} : vector<16x96xf32> to vector<16x32xf32>
    %cst_10 = arith.constant 0.353553385 : f32
    %17 = vector.broadcast %cst_10 : f32 to vector<16x32xf32>
    %18 = arith.mulf %16, %17 : vector<16x32xf32>
    %19 = vector.shape_cast %18 : vector<16x32xf32> to vector<2x8x32xf32>
    %20 = vector.extract_strided_slice %15 {offsets = [0, 32], sizes = [16, 32], strides = [1, 1]} : vector<16x96xf32> to vector<16x32xf32>
    %21 = vector.shape_cast %20 : vector<16x32xf32> to vector<2x8x32xf32>
    %22 = vector.extract_strided_slice %15 {offsets = [0, 64], sizes = [16, 32], strides = [1, 1]} : vector<16x96xf32> to vector<16x32xf32>
    %23 = vector.shape_cast %22 : vector<16x32xf32> to vector<2x8x32xf32>
    %24 = vector.extract_strided_slice %19 {offsets = [0, 0, 0], sizes = [2, 8, 8], strides = [1, 1, 1]} : vector<2x8x32xf32> to vector<2x8x8xf32>
    %25 = vector.extract_strided_slice %21 {offsets = [0, 0, 0], sizes = [2, 8, 8], strides = [1, 1, 1]} : vector<2x8x32xf32> to vector<2x8x8xf32>
    "tpu.trace_start"() <{level = 10 : i32, message = "bqd,bkd->bqk"}> : () -> ()
    %cst_11 = arith.constant dense<0.000000e+00> : vector<2x8x8xf32>
    %26 = tpu.matmul %24, %25, %cst_11 {dimension_numbers = #tpu.dot_dimension_numbers<[2], [2], [1], [1], [0, 0, 0, 1, 1, 1], [0], [0]>} : vector<2x8x8xf32>, vector<2x8x8xf32>, vector<2x8x8xf32> -> vector<2x8x8xf32>
    "tpu.trace_stop"() : () -> ()
    %27 = vector.broadcast %6 : vector<1x8x8xf32> to vector<2x8x8xf32>
    %28 = arith.addf %26, %27 : vector<2x8x8xf32>
    %cst_12 = arith.constant dense<0xFF800000> : vector<2x8xf32>
    %29 = vector.multi_reduction <maximumf>, %28, %cst_12 [2] : vector<2x8x8xf32> to vector<2x8xf32>
    %30 = vector.shape_cast %29 : vector<2x8xf32> to vector<2x8x1xf32>
    %31 = vector.broadcast %30 : vector<2x8x1xf32> to vector<2x8x8xf32>
    %32 = arith.subf %28, %31 : vector<2x8x8xf32>
    %33 = math.exp %32 : vector<2x8x8xf32>
    %cst_13 = arith.constant dense<0.000000e+00> : vector<2x8xf32>
    %34 = vector.multi_reduction <add>, %33, %cst_13 [2] : vector<2x8x8xf32> to vector<2x8xf32>
    %35 = vector.shape_cast %34 : vector<2x8xf32> to vector<2x8x1xf32>
    %36 = tpu.reciprocal %35 {approx = true} : vector<2x8x1xf32> -> vector<2x8x1xf32>
    %37 = vector.broadcast %36 : vector<2x8x1xf32> to vector<2x8x8xf32>
    %38 = arith.mulf %33, %37 : vector<2x8x8xf32>
    %39 = vector.extract_strided_slice %23 {offsets = [0, 0, 0], sizes = [2, 8, 8], strides = [1, 1, 1]} : vector<2x8x32xf32> to vector<2x8x8xf32>
    "tpu.trace_start"() <{level = 10 : i32, message = "bqk,bkd->bqd"}> : () -> ()
    %cst_14 = arith.constant dense<0.000000e+00> : vector<2x8x8xf32>
    %40 = tpu.matmul %38, %39, %cst_14 {dimension_numbers = #tpu.dot_dimension_numbers<[2], [1], [1], [2], [0, 0, 0, 1, 1, 2], [0], [0]>} : vector<2x8x8xf32>, vector<2x8x8xf32>, vector<2x8x8xf32> -> vector<2x8x8xf32>
    "tpu.trace_stop"() : () -> ()
    %c0_15 = arith.constant 0 : index
    %c0_16 = arith.constant 0 : index
    %c0_17 = arith.constant 0 : index
    %41 = vector.load %arg17[%c0_15, %c0_16, %c0_17] : memref<2x8x32xf32, #tpu.memory_space<vmem>>, vector<2x8x8xf32>
    tpu.vector_store %arg17[%c0_15, %c0_16, %c0_17], %40 {strides = array<i32>} : memref<2x8x32xf32, #tpu.memory_space<vmem>>, vector<2x8x8xf32>,
    %42 = vector.extract_strided_slice %19 {offsets = [0, 0, 8], sizes = [2, 8, 8], strides = [1, 1, 1]} : vector<2x8x32xf32> to vector<2x8x8xf32>
    %43 = vector.extract_strided_slice %21 {offsets = [0, 0, 8], sizes = [2, 8, 8], strides = [1, 1, 1]} : vector<2x8x32xf32> to vector<2x8x8xf32>
    "tpu.trace_start"() <{level = 10 : i32, message = "bqd,bkd->bqk"}> : () -> ()
    %cst_18 = arith.constant dense<0.000000e+00> : vector<2x8x8xf32>
    %44 = tpu.matmul %42, %43, %cst_18 {dimension_numbers = #tpu.dot_dimension_numbers<[2], [2], [1], [1], [0, 0, 0, 1, 1, 1], [0], [0]>} : vector<2x8x8xf32>, vector<2x8x8xf32>, vector<2x8x8xf32> -> vector<2x8x8xf32>
    "tpu.trace_stop"() : () -> ()
    %45 = vector.broadcast %6 : vector<1x8x8xf32> to vector<2x8x8xf32>
    %46 = arith.addf %44, %45 : vector<2x8x8xf32>
    %cst_19 = arith.constant dense<0xFF800000> : vector<2x8xf32>
    %47 = vector.multi_reduction <maximumf>, %46, %cst_19 [2] : vector<2x8x8xf32> to vector<2x8xf32>
    %48 = vector.shape_cast %47 : vector<2x8xf32> to vector<2x8x1xf32>
    %49 = vector.broadcast %48 : vector<2x8x1xf32> to vector<2x8x8xf32>
    %50 = arith.subf %46, %49 : vector<2x8x8xf32>
    %51 = math.exp %50 : vector<2x8x8xf32>
    %cst_20 = arith.constant dense<0.000000e+00> : vector<2x8xf32>
    %52 = vector.multi_reduction <add>, %51, %cst_20 [2] : vector<2x8x8xf32> to vector<2x8xf32>
    %53 = vector.shape_cast %52 : vector<2x8xf32> to vector<2x8x1xf32>
    %54 = tpu.reciprocal %53 {approx = true} : vector<2x8x1xf32> -> vector<2x8x1xf32>
    %55 = vector.broadcast %54 : vector<2x8x1xf32> to vector<2x8x8xf32>
    %56 = arith.mulf %51, %55 : vector<2x8x8xf32>
    %57 = vector.extract_strided_slice %23 {offsets = [0, 0, 8], sizes = [2, 8, 8], strides = [1, 1, 1]} : vector<2x8x32xf32> to vector<2x8x8xf32>
    "tpu.trace_start"() <{level = 10 : i32, message = "bqk,bkd->bqd"}> : () -> ()
    %cst_21 = arith.constant dense<0.000000e+00> : vector<2x8x8xf32>
    %58 = tpu.matmul %56, %57, %cst_21 {dimension_numbers = #tpu.dot_dimension_numbers<[2], [1], [1], [2], [0, 0, 0, 1, 1, 2], [0], [0]>} : vector<2x8x8xf32>, vector<2x8x8xf32>, vector<2x8x8xf32> -> vector<2x8x8xf32>
    "tpu.trace_stop"() : () -> ()
    %c0_22 = arith.constant 0 : index
    %c0_23 = arith.constant 0 : index
    %c8 = arith.constant 8 : index
    %59 = vector.load %arg17[%c0_22, %c0_23, %c8] : memref<2x8x32xf32, #tpu.memory_space<vmem>>, vector<2x8x8xf32>
    tpu.vector_store %arg17[%c0_22, %c0_23, %c8], %58 {strides = array<i32>} : memref<2x8x32xf32, #tpu.memory_space<vmem>>, vector<2x8x8xf32>,
    %60 = vector.extract_strided_slice %19 {offsets = [0, 0, 16], sizes = [2, 8, 8], strides = [1, 1, 1]} : vector<2x8x32xf32> to vector<2x8x8xf32>
    %61 = vector.extract_strided_slice %21 {offsets = [0, 0, 16], sizes = [2, 8, 8], strides = [1, 1, 1]} : vector<2x8x32xf32> to vector<2x8x8xf32>
    "tpu.trace_start"() <{level = 10 : i32, message = "bqd,bkd->bqk"}> : () -> ()
    %cst_24 = arith.constant dense<0.000000e+00> : vector<2x8x8xf32>
    %62 = tpu.matmul %60, %61, %cst_24 {dimension_numbers = #tpu.dot_dimension_numbers<[2], [2], [1], [1], [0, 0, 0, 1, 1, 1], [0], [0]>} : vector<2x8x8xf32>, vector<2x8x8xf32>, vector<2x8x8xf32> -> vector<2x8x8xf32>
    "tpu.trace_stop"() : () -> ()
    %63 = vector.broadcast %6 : vector<1x8x8xf32> to vector<2x8x8xf32>
    %64 = arith.addf %62, %63 : vector<2x8x8xf32>
    %cst_25 = arith.constant dense<0xFF800000> : vector<2x8xf32>
    %65 = vector.multi_reduction <maximumf>, %64, %cst_25 [2] : vector<2x8x8xf32> to vector<2x8xf32>
    %66 = vector.shape_cast %65 : vector<2x8xf32> to vector<2x8x1xf32>
    %67 = vector.broadcast %66 : vector<2x8x1xf32> to vector<2x8x8xf32>
    %68 = arith.subf %64, %67 : vector<2x8x8xf32>
    %69 = math.exp %68 : vector<2x8x8xf32>
    %cst_26 = arith.constant dense<0.000000e+00> : vector<2x8xf32>
    %70 = vector.multi_reduction <add>, %69, %cst_26 [2] : vector<2x8x8xf32> to vector<2x8xf32>
    %71 = vector.shape_cast %70 : vector<2x8xf32> to vector<2x8x1xf32>
    %72 = tpu.reciprocal %71 {approx = true} : vector<2x8x1xf32> -> vector<2x8x1xf32>
    %73 = vector.broadcast %72 : vector<2x8x1xf32> to vector<2x8x8xf32>
    %74 = arith.mulf %69, %73 : vector<2x8x8xf32>
    %75 = vector.extract_strided_slice %23 {offsets = [0, 0, 16], sizes = [2, 8, 8], strides = [1, 1, 1]} : vector<2x8x32xf32> to vector<2x8x8xf32>
    "tpu.trace_start"() <{level = 10 : i32, message = "bqk,bkd->bqd"}> : () -> ()
    %cst_27 = arith.constant dense<0.000000e+00> : vector<2x8x8xf32>
    %76 = tpu.matmul %74, %75, %cst_27 {dimension_numbers = #tpu.dot_dimension_numbers<[2], [1], [1], [2], [0, 0, 0, 1, 1, 2], [0], [0]>} : vector<2x8x8xf32>, vector<2x8x8xf32>, vector<2x8x8xf32> -> vector<2x8x8xf32>
    "tpu.trace_stop"() : () -> ()
    %c0_28 = arith.constant 0 : index
    %c0_29 = arith.constant 0 : index
    %c16 = arith.constant 16 : index
    %77 = vector.load %arg17[%c0_28, %c0_29, %c16] : memref<2x8x32xf32, #tpu.memory_space<vmem>>, vector<2x8x8xf32>
    tpu.vector_store %arg17[%c0_28, %c0_29, %c16], %76 {strides = array<i32>} : memref<2x8x32xf32, #tpu.memory_space<vmem>>, vector<2x8x8xf32>,
    %78 = vector.extract_strided_slice %19 {offsets = [0, 0, 24], sizes = [2, 8, 8], strides = [1, 1, 1]} : vector<2x8x32xf32> to vector<2x8x8xf32>
    %79 = vector.extract_strided_slice %21 {offsets = [0, 0, 24], sizes = [2, 8, 8], strides = [1, 1, 1]} : vector<2x8x32xf32> to vector<2x8x8xf32>
    "tpu.trace_start"() <{level = 10 : i32, message = "bqd,bkd->bqk"}> : () -> ()
    %cst_30 = arith.constant dense<0.000000e+00> : vector<2x8x8xf32>
    %80 = tpu.matmul %78, %79, %cst_30 {dimension_numbers = #tpu.dot_dimension_numbers<[2], [2], [1], [1], [0, 0, 0, 1, 1, 1], [0], [0]>} : vector<2x8x8xf32>, vector<2x8x8xf32>, vector<2x8x8xf32> -> vector<2x8x8xf32>
    "tpu.trace_stop"() : () -> ()
    %81 = vector.broadcast %6 : vector<1x8x8xf32> to vector<2x8x8xf32>
    %82 = arith.addf %80, %81 : vector<2x8x8xf32>
    %cst_31 = arith.constant dense<0xFF800000> : vector<2x8xf32>
    %83 = vector.multi_reduction <maximumf>, %82, %cst_31 [2] : vector<2x8x8xf32> to vector<2x8xf32>
    %84 = vector.shape_cast %83 : vector<2x8xf32> to vector<2x8x1xf32>
    %85 = vector.broadcast %84 : vector<2x8x1xf32> to vector<2x8x8xf32>
    %86 = arith.subf %82, %85 : vector<2x8x8xf32>
    %87 = math.exp %86 : vector<2x8x8xf32>
    %cst_32 = arith.constant dense<0.000000e+00> : vector<2x8xf32>
    %88 = vector.multi_reduction <add>, %87, %cst_32 [2] : vector<2x8x8xf32> to vector<2x8xf32>
    %89 = vector.shape_cast %88 : vector<2x8xf32> to vector<2x8x1xf32>
    %90 = tpu.reciprocal %89 {approx = true} : vector<2x8x1xf32> -> vector<2x8x1xf32>
    %91 = vector.broadcast %90 : vector<2x8x1xf32> to vector<2x8x8xf32>
    %92 = arith.mulf %87, %91 : vector<2x8x8xf32>
    %93 = vector.extract_strided_slice %23 {offsets = [0, 0, 24], sizes = [2, 8, 8], strides = [1, 1, 1]} : vector<2x8x32xf32> to vector<2x8x8xf32>
    "tpu.trace_start"() <{level = 10 : i32, message = "bqk,bkd->bqd"}> : () -> ()
    %cst_33 = arith.constant dense<0.000000e+00> : vector<2x8x8xf32>
    %94 = tpu.matmul %92, %93, %cst_33 {dimension_numbers = #tpu.dot_dimension_numbers<[2], [1], [1], [2], [0, 0, 0, 1, 1, 2], [0], [0]>} : vector<2x8x8xf32>, vector<2x8x8xf32>, vector<2x8x8xf32> -> vector<2x8x8xf32>
    "tpu.trace_stop"() : () -> ()
    %c0_34 = arith.constant 0 : index
    %c0_35 = arith.constant 0 : index
    %c24 = arith.constant 24 : index
    %95 = vector.load %arg17[%c0_34, %c0_35, %c24] : memref<2x8x32xf32, #tpu.memory_space<vmem>>, vector<2x8x8xf32>
    tpu.vector_store %arg17[%c0_34, %c0_35, %c24], %94 {strides = array<i32>} : memref<2x8x32xf32, #tpu.memory_space<vmem>>, vector<2x8x8xf32>,
    %c0_36 = arith.constant 0 : index
    %c0_37 = arith.constant 0 : index
    %c0_38 = arith.constant 0 : index
    %96 = vector.load %arg17[%c0_36, %c0_37, %c0_38] : memref<2x8x32xf32, #tpu.memory_space<vmem>>, vector<2x8x32xf32>
    %97 = vector.shape_cast %96 : vector<2x8x32xf32> to vector<16x32xf32>
    %c0_39 = arith.constant 0 : index
    %c0_40 = arith.constant 0 : index
    %c0_41 = arith.constant 0 : index
    %98 = vector.load %arg4[%c0_39, %c0_40, %c0_41] : memref<2x32x32xf32, #tpu.memory_space<vmem>>, vector<1x32x32xf32>
    %99 = vector.shape_cast %98 : vector<1x32x32xf32> to vector<32x32xf32>
    %cst_42 = arith.constant dense<0.000000e+00> : vector<16x32xf32>
    %100 = tpu.matmul %97, %99, %cst_42 {dimension_numbers = #tpu.dot_dimension_numbers<[1], [0], [0], [1], [0, 0, 1, 1], [], []>} : vector<16x32xf32>, vector<32x32xf32>, vector<16x32xf32> -> vector<16x32xf32>
    %c0_43 = arith.constant 0 : index
    %c0_44 = arith.constant 0 : index
    %c0_45 = arith.constant 0 : index
    %101 = vector.load %arg5[%c0_43, %c0_44, %c0_45] : memref<2x1x32xf32, #tpu.memory_space<vmem>>, vector<1x1x32xf32>
    %102 = vector.shape_cast %101 : vector<1x1x32xf32> to vector<1x32xf32>
    %103 = vector.broadcast %102 : vector<1x32xf32> to vector<16x32xf32>
    %104 = arith.addf %100, %103 : vector<16x32xf32>
    %105 = arith.addf %8, %104 : vector<16x32xf32>
    %c0_46 = arith.constant 0 : index
    %c0_47 = arith.constant 0 : index
    %c0_48 = arith.constant 0 : index
    %106 = vector.load %arg10[%c0_46, %c0_47, %c0_48] : memref<2x1x32xf32, #tpu.memory_space<vmem>>, vector<1x1x32xf32>
    %107 = vector.shape_cast %106 : vector<1x1x32xf32> to vector<1x32xf32>
    %c0_49 = arith.constant 0 : index
    %c0_50 = arith.constant 0 : index
    %c0_51 = arith.constant 0 : index
    %108 = vector.load %arg11[%c0_49, %c0_50, %c0_51] : memref<2x1x32xf32, #tpu.memory_space<vmem>>, vector<1x1x32xf32>
    %109 = vector.shape_cast %108 : vector<1x1x32xf32> to vector<1x32xf32>
    %cst_52 = arith.constant dense<0.000000e+00> : vector<16xf32>
    %110 = vector.multi_reduction <add>, %105, %cst_52 [1] : vector<16x32xf32> to vector<16xf32>
    %111 = vector.shape_cast %110 : vector<16xf32> to vector<16x1xf32>
    %cst_53 = arith.constant 3.200000e+01 : f32
    %112 = vector.broadcast %cst_53 : f32 to vector<16x1xf32>
    %113 = arith.divf %111, %112 : vector<16x1xf32>
    %114 = vector.broadcast %113 : vector<16x1xf32> to vector<16x32xf32>
    %115 = arith.subf %105, %114 : vector<16x32xf32>
    %116 = arith.mulf %115, %115 : vector<16x32xf32>
    %cst_54 = arith.constant dense<0.000000e+00> : vector<16xf32>
    %117 = vector.multi_reduction <add>, %116, %cst_54 [1] : vector<16x32xf32> to vector<16xf32>
    %118 = vector.shape_cast %117 : vector<16xf32> to vector<16x1xf32>
    %cst_55 = arith.constant 3.200000e+01 : f32
    %119 = vector.broadcast %cst_55 : f32 to vector<16x1xf32>
    %120 = arith.divf %118, %119 : vector<16x1xf32>
    %121 = vector.broadcast %113 : vector<16x1xf32> to vector<16x32xf32>
    %122 = arith.subf %105, %121 : vector<16x32xf32>
    %cst_56 = arith.constant 9.99999974E-6 : f32
    %123 = vector.broadcast %cst_56 : f32 to vector<16x1xf32>
    %124 = arith.addf %120, %123 : vector<16x1xf32>
    %125 = math.rsqrt %124 : vector<16x1xf32>
    %126 = vector.broadcast %125 : vector<16x1xf32> to vector<16x32xf32>
    %127 = arith.mulf %122, %126 : vector<16x32xf32>
    %128 = vector.broadcast %107 : vector<1x32xf32> to vector<16x32xf32>
    %129 = arith.mulf %127, %128 : vector<16x32xf32>
    %130 = vector.broadcast %109 : vector<1x32xf32> to vector<16x32xf32>
    %131 = arith.addf %129, %130 : vector<16x32xf32>
    %c0_57 = arith.constant 0 : index
    %c0_58 = arith.constant 0 : index
    %c0_59 = arith.constant 0 : index
    %132 = vector.load %arg6[%c0_57, %c0_58, %c0_59] : memref<2x32x64xf32, #tpu.memory_space<vmem>>, vector<1x32x64xf32>
    %133 = vector.shape_cast %132 : vector<1x32x64xf32> to vector<32x64xf32>
    %cst_60 = arith.constant dense<0.000000e+00> : vector<16x64xf32>
    %134 = tpu.matmul %131, %133, %cst_60 {dimension_numbers = #tpu.dot_dimension_numbers<[1], [0], [0], [1], [0, 0, 1, 1], [], []>} : vector<16x32xf32>, vector<32x64xf32>, vector<16x64xf32> -> vector<16x64xf32>
    %c0_61 = arith.constant 0 : index
    %c0_62 = arith.constant 0 : index
    %c0_63 = arith.constant 0 : index
    %135 = vector.load %arg7[%c0_61, %c0_62, %c0_63] : memref<2x1x64xf32, #tpu.memory_space<vmem>>, vector<1x1x64xf32>
    %136 = vector.shape_cast %135 : vector<1x1x64xf32> to vector<1x64xf32>
    %137 = vector.broadcast %136 : vector<1x64xf32> to vector<16x64xf32>
    %138 = arith.addf %134, %137 : vector<16x64xf32>
    %cst_64 = arith.constant 5.000000e-01 : f32
    %139 = vector.broadcast %cst_64 : f32 to vector<16x64xf32>
    %140 = arith.mulf %139, %138 : vector<16x64xf32>
    %cst_65 = arith.constant 0.707106769 : f32
    %141 = vector.broadcast %cst_65 : f32 to vector<16x64xf32>
    %142 = arith.mulf %138, %141 : vector<16x64xf32>
    %143 = math.absf %142 : vector<16x64xf32>
    %cst_66 = arith.constant 0.327591091 : f32
    %144 = vector.broadcast %cst_66 : f32 to vector<16x64xf32>
    %145 = arith.mulf %144, %143 : vector<16x64xf32>
    %cst_67 = arith.constant 1.000000e+00 : f32
    %146 = vector.broadcast %cst_67 : f32 to vector<16x64xf32>
    %147 = arith.addf %146, %145 : vector<16x64xf32>
    %cst_68 = arith.constant 1.000000e+00 : f32
    %148 = vector.broadcast %cst_68 : f32 to vector<16x64xf32>
    %149 = arith.divf %148, %147 : vector<16x64xf32>
    %cst_69 = arith.constant 1.06140542 : f32
    %150 = vector.broadcast %cst_69 : f32 to vector<16x64xf32>
    %151 = arith.mulf %150, %149 : vector<16x64xf32>
    %cst_70 = arith.constant -1.45315206 : f32
    %152 = vector.broadcast %cst_70 : f32 to vector<16x64xf32>
    %153 = arith.addf %151, %152 : vector<16x64xf32>
    %154 = arith.mulf %153, %149 : vector<16x64xf32>
    %cst_71 = arith.constant 1.42141378 : f32
    %155 = vector.broadcast %cst_71 : f32 to vector<16x64xf32>
    %156 = arith.addf %154, %155 : vector<16x64xf32>
    %157 = arith.mulf %156, %149 : vector<16x64xf32>
    %cst_72 = arith.constant -0.284496725 : f32
    %158 = vector.broadcast %cst_72 : f32 to vector<16x64xf32>
    %159 = arith.addf %157, %158 : vector<16x64xf32>
    %160 = arith.mulf %159, %149 : vector<16x64xf32>
    %cst_73 = arith.constant 0.254829586 : f32
    %161 = vector.broadcast %cst_73 : f32 to vector<16x64xf32>
    %162 = arith.addf %160, %161 : vector<16x64xf32>
    %163 = arith.mulf %162, %149 : vector<16x64xf32>
    %cst_74 = arith.constant 0.000000e+00 : f32
    %164 = vector.broadcast %cst_74 : f32 to vector<16x64xf32>
    %165 = arith.subf %164, %143 : vector<16x64xf32>
    %166 = arith.mulf %165, %143 : vector<16x64xf32>
    %167 = math.exp %166 : vector<16x64xf32>
    %168 = arith.mulf %163, %167 : vector<16x64xf32>
    %cst_75 = arith.constant 1.000000e+00 : f32
    %169 = vector.broadcast %cst_75 : f32 to vector<16x64xf32>
    %170 = arith.subf %169, %168 : vector<16x64xf32>
    %cst_76 = arith.constant 0.000000e+00 : f32
    %171 = vector.broadcast %cst_76 : f32 to vector<16x64xf32>
    %172 = arith.cmpf oge, %142, %171 : vector<16x64xf32>
    %cst_77 = arith.constant 0.000000e+00 : f32
    %173 = vector.broadcast %cst_77 : f32 to vector<16x64xf32>
    %174 = arith.subf %173, %170 : vector<16x64xf32>
    %175 = arith.select %172, %170, %174 : vector<16x64xi1>, vector<16x64xf32>
    %cst_78 = arith.constant 1.000000e+00 : f32
    %176 = vector.broadcast %cst_78 : f32 to vector<16x64xf32>
    %177 = arith.addf %176, %175 : vector<16x64xf32>
    %178 = arith.mulf %140, %177 : vector<16x64xf32>
    %c0_79 = arith.constant 0 : index
    %c0_80 = arith.constant 0 : index
    %c0_81 = arith.constant 0 : index
    %179 = vector.load %arg8[%c0_79, %c0_80, %c0_81] : memref<2x64x32xf32, #tpu.memory_space<vmem>>, vector<1x64x32xf32>
    %180 = vector.shape_cast %179 : vector<1x64x32xf32> to vector<64x32xf32>
    %cst_82 = arith.constant dense<0.000000e+00> : vector<16x32xf32>
    %181 = tpu.matmul %178, %180, %cst_82 {dimension_numbers = #tpu.dot_dimension_numbers<[1], [0], [0], [1], [0, 0, 1, 1], [], []>} : vector<16x64xf32>, vector<64x32xf32>, vector<16x32xf32> -> vector<16x32xf32>
    %c0_83 = arith.constant 0 : index
    %c0_84 = arith.constant 0 : index
    %c0_85 = arith.constant 0 : index
    %182 = vector.load %arg9[%c0_83, %c0_84, %c0_85] : memref<2x1x32xf32, #tpu.memory_space<vmem>>, vector<1x1x32xf32>
    %183 = vector.shape_cast %182 : vector<1x1x32xf32> to vector<1x32xf32>
    %184 = vector.broadcast %183 : vector<1x32xf32> to vector<16x32xf32>
    %185 = arith.addf %181, %184 : vector<16x32xf32>
    %186 = arith.addf %131, %185 : vector<16x32xf32>
    %c0_86 = arith.constant 0 : index
    %c0_87 = arith.constant 0 : index
    %c0_88 = arith.constant 0 : index
    %187 = vector.load %arg12[%c0_86, %c0_87, %c0_88] : memref<2x1x32xf32, #tpu.memory_space<vmem>>, vector<1x1x32xf32>
    %188 = vector.shape_cast %187 : vector<1x1x32xf32> to vector<1x32xf32>
    %c0_89 = arith.constant 0 : index
    %c0_90 = arith.constant 0 : index
    %c0_91 = arith.constant 0 : index
    %189 = vector.load %arg13[%c0_89, %c0_90, %c0_91] : memref<2x1x32xf32, #tpu.memory_space<vmem>>, vector<1x1x32xf32>
    %190 = vector.shape_cast %189 : vector<1x1x32xf32> to vector<1x32xf32>
    %cst_92 = arith.constant dense<0.000000e+00> : vector<16xf32>
    %191 = vector.multi_reduction <add>, %186, %cst_92 [1] : vector<16x32xf32> to vector<16xf32>
    %192 = vector.shape_cast %191 : vector<16xf32> to vector<16x1xf32>
    %cst_93 = arith.constant 3.200000e+01 : f32
    %193 = vector.broadcast %cst_93 : f32 to vector<16x1xf32>
    %194 = arith.divf %192, %193 : vector<16x1xf32>
    %195 = vector.broadcast %194 : vector<16x1xf32> to vector<16x32xf32>
    %196 = arith.subf %186, %195 : vector<16x32xf32>
    %197 = arith.mulf %196, %196 : vector<16x32xf32>
    %cst_94 = arith.constant dense<0.000000e+00> : vector<16xf32>
    %198 = vector.multi_reduction <add>, %197, %cst_94 [1] : vector<16x32xf32> to vector<16xf32>
    %199 = vector.shape_cast %198 : vector<16xf32> to vector<16x1xf32>
    %cst_95 = arith.constant 3.200000e+01 : f32
    %200 = vector.broadcast %cst_95 : f32 to vector<16x1xf32>
    %201 = arith.divf %199, %200 : vector<16x1xf32>
    %202 = vector.broadcast %194 : vector<16x1xf32> to vector<16x32xf32>
    %203 = arith.subf %186, %202 : vector<16x32xf32>
    %cst_96 = arith.constant 9.99999974E-6 : f32
    %204 = vector.broadcast %cst_96 : f32 to vector<16x1xf32>
    %205 = arith.addf %201, %204 : vector<16x1xf32>
    %206 = math.rsqrt %205 : vector<16x1xf32>
    %207 = vector.broadcast %206 : vector<16x1xf32> to vector<16x32xf32>
    %208 = arith.mulf %203, %207 : vector<16x32xf32>
    %209 = vector.broadcast %188 : vector<1x32xf32> to vector<16x32xf32>
    %210 = arith.mulf %208, %209 : vector<16x32xf32>
    %211 = vector.broadcast %190 : vector<1x32xf32> to vector<16x32xf32>
    %212 = arith.addf %210, %211 : vector<16x32xf32>
    %213 = vector.shape_cast %212 : vector<16x32xf32> to vector<2x8x32xf32>
    %214 = vector.shape_cast %213 : vector<2x8x32xf32> to vector<16x32xf32>
    %c1 = arith.constant 1 : index
    %c0_97 = arith.constant 0 : index
    %c0_98 = arith.constant 0 : index
    %215 = vector.load %arg2[%c1, %c0_97, %c0_98] : memref<2x32x96xf32, #tpu.memory_space<vmem>>, vector<1x32x96xf32>
    %216 = vector.shape_cast %215 : vector<1x32x96xf32> to vector<32x96xf32>
    %cst_99 = arith.constant dense<0.000000e+00> : vector<16x96xf32>
    %217 = tpu.matmul %214, %216, %cst_99 {dimension_numbers = #tpu.dot_dimension_numbers<[1], [0], [0], [1], [0, 0, 1, 1], [], []>} : vector<16x32xf32>, vector<32x96xf32>, vector<16x96xf32> -> vector<16x96xf32>
    %c1_100 = arith.constant 1 : index
    %c0_101 = arith.constant 0 : index
    %c0_102 = arith.constant 0 : index
    %218 = vector.load %arg3[%c1_100, %c0_101, %c0_102] : memref<2x1x96xf32, #tpu.memory_space<vmem>>, vector<1x1x96xf32>
    %219 = vector.shape_cast %218 : vector<1x1x96xf32> to vector<1x96xf32>
    %220 = vector.broadcast %219 : vector<1x96xf32> to vector<16x96xf32>
    %221 = arith.addf %217, %220 : vector<16x96xf32>
    %222 = vector.extract_strided_slice %221 {offsets = [0, 0], sizes = [16, 32], strides = [1, 1]} : vector<16x96xf32> to vector<16x32xf32>
    %cst_103 = arith.constant 0.353553385 : f32
    %223 = vector.broadcast %cst_103 : f32 to vector<16x32xf32>
    %224 = arith.mulf %222, %223 : vector<16x32xf32>
    %225 = vector.shape_cast %224 : vector<16x32xf32> to vector<2x8x32xf32>
    %226 = vector.extract_strided_slice %221 {offsets = [0, 32], sizes = [16, 32], strides = [1, 1]} : vector<16x96xf32> to vector<16x32xf32>
    %227 = vector.shape_cast %226 : vector<16x32xf32> to vector<2x8x32xf32>
    %228 = vector.extract_strided_slice %221 {offsets = [0, 64], sizes = [16, 32], strides = [1, 1]} : vector<16x96xf32> to vector<16x32xf32>
    %229 = vector.shape_cast %228 : vector<16x32xf32> to vector<2x8x32xf32>
    %230 = vector.extract_strided_slice %225 {offsets = [0, 0, 0], sizes = [2, 8, 8], strides = [1, 1, 1]} : vector<2x8x32xf32> to vector<2x8x8xf32>
    %231 = vector.extract_strided_slice %227 {offsets = [0, 0, 0], sizes = [2, 8, 8], strides = [1, 1, 1]} : vector<2x8x32xf32> to vector<2x8x8xf32>
    "tpu.trace_start"() <{level = 10 : i32, message = "bqd,bkd->bqk"}> : () -> ()
    %cst_104 = arith.constant dense<0.000000e+00> : vector<2x8x8xf32>
    %232 = tpu.matmul %230, %231, %cst_104 {dimension_numbers = #tpu.dot_dimension_numbers<[2], [2], [1], [1], [0, 0, 0, 1, 1, 1], [0], [0]>} : vector<2x8x8xf32>, vector<2x8x8xf32>, vector<2x8x8xf32> -> vector<2x8x8xf32>
    "tpu.trace_stop"() : () -> ()
    %233 = vector.broadcast %6 : vector<1x8x8xf32> to vector<2x8x8xf32>
    %234 = arith.addf %232, %233 : vector<2x8x8xf32>
    %cst_105 = arith.constant dense<0xFF800000> : vector<2x8xf32>
    %235 = vector.multi_reduction <maximumf>, %234, %cst_105 [2] : vector<2x8x8xf32> to vector<2x8xf32>
    %236 = vector.shape_cast %235 : vector<2x8xf32> to vector<2x8x1xf32>
    %237 = vector.broadcast %236 : vector<2x8x1xf32> to vector<2x8x8xf32>
    %238 = arith.subf %234, %237 : vector<2x8x8xf32>
    %239 = math.exp %238 : vector<2x8x8xf32>
    %cst_106 = arith.constant dense<0.000000e+00> : vector<2x8xf32>
    %240 = vector.multi_reduction <add>, %239, %cst_106 [2] : vector<2x8x8xf32> to vector<2x8xf32>
    %241 = vector.shape_cast %240 : vector<2x8xf32> to vector<2x8x1xf32>
    %242 = tpu.reciprocal %241 {approx = true} : vector<2x8x1xf32> -> vector<2x8x1xf32>
    %243 = vector.broadcast %242 : vector<2x8x1xf32> to vector<2x8x8xf32>
    %244 = arith.mulf %239, %243 : vector<2x8x8xf32>
    %245 = vector.extract_strided_slice %229 {offsets = [0, 0, 0], sizes = [2, 8, 8], strides = [1, 1, 1]} : vector<2x8x32xf32> to vector<2x8x8xf32>
    "tpu.trace_start"() <{level = 10 : i32, message = "bqk,bkd->bqd"}> : () -> ()
    %cst_107 = arith.constant dense<0.000000e+00> : vector<2x8x8xf32>
    %246 = tpu.matmul %244, %245, %cst_107 {dimension_numbers = #tpu.dot_dimension_numbers<[2], [1], [1], [2], [0, 0, 0, 1, 1, 2], [0], [0]>} : vector<2x8x8xf32>, vector<2x8x8xf32>, vector<2x8x8xf32> -> vector<2x8x8xf32>
    "tpu.trace_stop"() : () -> ()
    %c0_108 = arith.constant 0 : index
    %c0_109 = arith.constant 0 : index
    %c0_110 = arith.constant 0 : index
    %247 = vector.load %arg17[%c0_108, %c0_109, %c0_110] : memref<2x8x32xf32, #tpu.memory_space<vmem>>, vector<2x8x8xf32>
    tpu.vector_store %arg17[%c0_108, %c0_109, %c0_110], %246 {strides = array<i32>} : memref<2x8x32xf32, #tpu.memory_space<vmem>>, vector<2x8x8xf32>,
    %248 = vector.extract_strided_slice %225 {offsets = [0, 0, 8], sizes = [2, 8, 8], strides = [1, 1, 1]} : vector<2x8x32xf32> to vector<2x8x8xf32>
    %249 = vector.extract_strided_slice %227 {offsets = [0, 0, 8], sizes = [2, 8, 8], strides = [1, 1, 1]} : vector<2x8x32xf32> to vector<2x8x8xf32>
    "tpu.trace_start"() <{level = 10 : i32, message = "bqd,bkd->bqk"}> : () -> ()
    %cst_111 = arith.constant dense<0.000000e+00> : vector<2x8x8xf32>
    %250 = tpu.matmul %248, %249, %cst_111 {dimension_numbers = #tpu.dot_dimension_numbers<[2], [2], [1], [1], [0, 0, 0, 1, 1, 1], [0], [0]>} : vector<2x8x8xf32>, vector<2x8x8xf32>, vector<2x8x8xf32> -> vector<2x8x8xf32>
    "tpu.trace_stop"() : () -> ()
    %251 = vector.broadcast %6 : vector<1x8x8xf32> to vector<2x8x8xf32>
    %252 = arith.addf %250, %251 : vector<2x8x8xf32>
    %cst_112 = arith.constant dense<0xFF800000> : vector<2x8xf32>
    %253 = vector.multi_reduction <maximumf>, %252, %cst_112 [2] : vector<2x8x8xf32> to vector<2x8xf32>
    %254 = vector.shape_cast %253 : vector<2x8xf32> to vector<2x8x1xf32>
    %255 = vector.broadcast %254 : vector<2x8x1xf32> to vector<2x8x8xf32>
    %256 = arith.subf %252, %255 : vector<2x8x8xf32>
    %257 = math.exp %256 : vector<2x8x8xf32>
    %cst_113 = arith.constant dense<0.000000e+00> : vector<2x8xf32>
    %258 = vector.multi_reduction <add>, %257, %cst_113 [2] : vector<2x8x8xf32> to vector<2x8xf32>
    %259 = vector.shape_cast %258 : vector<2x8xf32> to vector<2x8x1xf32>
    %260 = tpu.reciprocal %259 {approx = true} : vector<2x8x1xf32> -> vector<2x8x1xf32>
    %261 = vector.broadcast %260 : vector<2x8x1xf32> to vector<2x8x8xf32>
    %262 = arith.mulf %257, %261 : vector<2x8x8xf32>
    %263 = vector.extract_strided_slice %229 {offsets = [0, 0, 8], sizes = [2, 8, 8], strides = [1, 1, 1]} : vector<2x8x32xf32> to vector<2x8x8xf32>
    "tpu.trace_start"() <{level = 10 : i32, message = "bqk,bkd->bqd"}> : () -> ()
    %cst_114 = arith.constant dense<0.000000e+00> : vector<2x8x8xf32>
    %264 = tpu.matmul %262, %263, %cst_114 {dimension_numbers = #tpu.dot_dimension_numbers<[2], [1], [1], [2], [0, 0, 0, 1, 1, 2], [0], [0]>} : vector<2x8x8xf32>, vector<2x8x8xf32>, vector<2x8x8xf32> -> vector<2x8x8xf32>
    "tpu.trace_stop"() : () -> ()
    %c0_115 = arith.constant 0 : index
    %c0_116 = arith.constant 0 : index
    %c8_117 = arith.constant 8 : index
    %265 = vector.load %arg17[%c0_115, %c0_116, %c8_117] : memref<2x8x32xf32, #tpu.memory_space<vmem>>, vector<2x8x8xf32>
    tpu.vector_store %arg17[%c0_115, %c0_116, %c8_117], %264 {strides = array<i32>} : memref<2x8x32xf32, #tpu.memory_space<vmem>>, vector<2x8x8xf32>,
    %266 = vector.extract_strided_slice %225 {offsets = [0, 0, 16], sizes = [2, 8, 8], strides = [1, 1, 1]} : vector<2x8x32xf32> to vector<2x8x8xf32>
    %267 = vector.extract_strided_slice %227 {offsets = [0, 0, 16], sizes = [2, 8, 8], strides = [1, 1, 1]} : vector<2x8x32xf32> to vector<2x8x8xf32>
    "tpu.trace_start"() <{level = 10 : i32, message = "bqd,bkd->bqk"}> : () -> ()
    %cst_118 = arith.constant dense<0.000000e+00> : vector<2x8x8xf32>
    %268 = tpu.matmul %266, %267, %cst_118 {dimension_numbers = #tpu.dot_dimension_numbers<[2], [2], [1], [1], [0, 0, 0, 1, 1, 1], [0], [0]>} : vector<2x8x8xf32>, vector<2x8x8xf32>, vector<2x8x8xf32> -> vector<2x8x8xf32>
    "tpu.trace_stop"() : () -> ()
    %269 = vector.broadcast %6 : vector<1x8x8xf32> to vector<2x8x8xf32>
    %270 = arith.addf %268, %269 : vector<2x8x8xf32>
    %cst_119 = arith.constant dense<0xFF800000> : vector<2x8xf32>
    %271 = vector.multi_reduction <maximumf>, %270, %cst_119 [2] : vector<2x8x8xf32> to vector<2x8xf32>
    %272 = vector.shape_cast %271 : vector<2x8xf32> to vector<2x8x1xf32>
    %273 = vector.broadcast %272 : vector<2x8x1xf32> to vector<2x8x8xf32>
    %274 = arith.subf %270, %273 : vector<2x8x8xf32>
    %275 = math.exp %274 : vector<2x8x8xf32>
    %cst_120 = arith.constant dense<0.000000e+00> : vector<2x8xf32>
    %276 = vector.multi_reduction <add>, %275, %cst_120 [2] : vector<2x8x8xf32> to vector<2x8xf32>
    %277 = vector.shape_cast %276 : vector<2x8xf32> to vector<2x8x1xf32>
    %278 = tpu.reciprocal %277 {approx = true} : vector<2x8x1xf32> -> vector<2x8x1xf32>
    %279 = vector.broadcast %278 : vector<2x8x1xf32> to vector<2x8x8xf32>
    %280 = arith.mulf %275, %279 : vector<2x8x8xf32>
    %281 = vector.extract_strided_slice %229 {offsets = [0, 0, 16], sizes = [2, 8, 8], strides = [1, 1, 1]} : vector<2x8x32xf32> to vector<2x8x8xf32>
    "tpu.trace_start"() <{level = 10 : i32, message = "bqk,bkd->bqd"}> : () -> ()
    %cst_121 = arith.constant dense<0.000000e+00> : vector<2x8x8xf32>
    %282 = tpu.matmul %280, %281, %cst_121 {dimension_numbers = #tpu.dot_dimension_numbers<[2], [1], [1], [2], [0, 0, 0, 1, 1, 2], [0], [0]>} : vector<2x8x8xf32>, vector<2x8x8xf32>, vector<2x8x8xf32> -> vector<2x8x8xf32>
    "tpu.trace_stop"() : () -> ()
    %c0_122 = arith.constant 0 : index
    %c0_123 = arith.constant 0 : index
    %c16_124 = arith.constant 16 : index
    %283 = vector.load %arg17[%c0_122, %c0_123, %c16_124] : memref<2x8x32xf32, #tpu.memory_space<vmem>>, vector<2x8x8xf32>
    tpu.vector_store %arg17[%c0_122, %c0_123, %c16_124], %282 {strides = array<i32>} : memref<2x8x32xf32, #tpu.memory_space<vmem>>, vector<2x8x8xf32>,
    %284 = vector.extract_strided_slice %225 {offsets = [0, 0, 24], sizes = [2, 8, 8], strides = [1, 1, 1]} : vector<2x8x32xf32> to vector<2x8x8xf32>
    %285 = vector.extract_strided_slice %227 {offsets = [0, 0, 24], sizes = [2, 8, 8], strides = [1, 1, 1]} : vector<2x8x32xf32> to vector<2x8x8xf32>
    "tpu.trace_start"() <{level = 10 : i32, message = "bqd,bkd->bqk"}> : () -> ()
    %cst_125 = arith.constant dense<0.000000e+00> : vector<2x8x8xf32>
    %286 = tpu.matmul %284, %285, %cst_125 {dimension_numbers = #tpu.dot_dimension_numbers<[2], [2], [1], [1], [0, 0, 0, 1, 1, 1], [0], [0]>} : vector<2x8x8xf32>, vector<2x8x8xf32>, vector<2x8x8xf32> -> vector<2x8x8xf32>
    "tpu.trace_stop"() : () -> ()
    %287 = vector.broadcast %6 : vector<1x8x8xf32> to vector<2x8x8xf32>
    %288 = arith.addf %286, %287 : vector<2x8x8xf32>
    %cst_126 = arith.constant dense<0xFF800000> : vector<2x8xf32>
    %289 = vector.multi_reduction <maximumf>, %288, %cst_126 [2] : vector<2x8x8xf32> to vector<2x8xf32>
    %290 = vector.shape_cast %289 : vector<2x8xf32> to vector<2x8x1xf32>
    %291 = vector.broadcast %290 : vector<2x8x1xf32> to vector<2x8x8xf32>
    %292 = arith.subf %288, %291 : vector<2x8x8xf32>
    %293 = math.exp %292 : vector<2x8x8xf32>
    %cst_127 = arith.constant dense<0.000000e+00> : vector<2x8xf32>
    %294 = vector.multi_reduction <add>, %293, %cst_127 [2] : vector<2x8x8xf32> to vector<2x8xf32>
    %295 = vector.shape_cast %294 : vector<2x8xf32> to vector<2x8x1xf32>
    %296 = tpu.reciprocal %295 {approx = true} : vector<2x8x1xf32> -> vector<2x8x1xf32>
    %297 = vector.broadcast %296 : vector<2x8x1xf32> to vector<2x8x8xf32>
    %298 = arith.mulf %293, %297 : vector<2x8x8xf32>
    %299 = vector.extract_strided_slice %229 {offsets = [0, 0, 24], sizes = [2, 8, 8], strides = [1, 1, 1]} : vector<2x8x32xf32> to vector<2x8x8xf32>
    "tpu.trace_start"() <{level = 10 : i32, message = "bqk,bkd->bqd"}> : () -> ()
    %cst_128 = arith.constant dense<0.000000e+00> : vector<2x8x8xf32>
    %300 = tpu.matmul %298, %299, %cst_128 {dimension_numbers = #tpu.dot_dimension_numbers<[2], [1], [1], [2], [0, 0, 0, 1, 1, 2], [0], [0]>} : vector<2x8x8xf32>, vector<2x8x8xf32>, vector<2x8x8xf32> -> vector<2x8x8xf32>
    "tpu.trace_stop"() : () -> ()
    %c0_129 = arith.constant 0 : index
    %c0_130 = arith.constant 0 : index
    %c24_131 = arith.constant 24 : index
    %301 = vector.load %arg17[%c0_129, %c0_130, %c24_131] : memref<2x8x32xf32, #tpu.memory_space<vmem>>, vector<2x8x8xf32>
    tpu.vector_store %arg17[%c0_129, %c0_130, %c24_131], %300 {strides = array<i32>} : memref<2x8x32xf32, #tpu.memory_space<vmem>>, vector<2x8x8xf32>,
    %c0_132 = arith.constant 0 : index
    %c0_133 = arith.constant 0 : index
    %c0_134 = arith.constant 0 : index
    %302 = vector.load %arg17[%c0_132, %c0_133, %c0_134] : memref<2x8x32xf32, #tpu.memory_space<vmem>>, vector<2x8x32xf32>
    %303 = vector.shape_cast %302 : vector<2x8x32xf32> to vector<16x32xf32>
    %c1_135 = arith.constant 1 : index
    %c0_136 = arith.constant 0 : index
    %c0_137 = arith.constant 0 : index
    %304 = vector.load %arg4[%c1_135, %c0_136, %c0_137] : memref<2x32x32xf32, #tpu.memory_space<vmem>>, vector<1x32x32xf32>
    %305 = vector.shape_cast %304 : vector<1x32x32xf32> to vector<32x32xf32>
    %cst_138 = arith.constant dense<0.000000e+00> : vector<16x32xf32>
    %306 = tpu.matmul %303, %305, %cst_138 {dimension_numbers = #tpu.dot_dimension_numbers<[1], [0], [0], [1], [0, 0, 1, 1], [], []>} : vector<16x32xf32>, vector<32x32xf32>, vector<16x32xf32> -> vector<16x32xf32>
    %c1_139 = arith.constant 1 : index
    %c0_140 = arith.constant 0 : index
    %c0_141 = arith.constant 0 : index
    %307 = vector.load %arg5[%c1_139, %c0_140, %c0_141] : memref<2x1x32xf32, #tpu.memory_space<vmem>>, vector<1x1x32xf32>
    %308 = vector.shape_cast %307 : vector<1x1x32xf32> to vector<1x32xf32>
    %309 = vector.broadcast %308 : vector<1x32xf32> to vector<16x32xf32>
    %310 = arith.addf %306, %309 : vector<16x32xf32>
    %311 = arith.addf %214, %310 : vector<16x32xf32>
    %c1_142 = arith.constant 1 : index
    %c0_143 = arith.constant 0 : index
    %c0_144 = arith.constant 0 : index
    %312 = vector.load %arg10[%c1_142, %c0_143, %c0_144] : memref<2x1x32xf32, #tpu.memory_space<vmem>>, vector<1x1x32xf32>
    %313 = vector.shape_cast %312 : vector<1x1x32xf32> to vector<1x32xf32>
    %c1_145 = arith.constant 1 : index
    %c0_146 = arith.constant 0 : index
    %c0_147 = arith.constant 0 : index
    %314 = vector.load %arg11[%c1_145, %c0_146, %c0_147] : memref<2x1x32xf32, #tpu.memory_space<vmem>>, vector<1x1x32xf32>
    %315 = vector.shape_cast %314 : vector<1x1x32xf32> to vector<1x32xf32>
    %cst_148 = arith.constant dense<0.000000e+00> : vector<16xf32>
    %316 = vector.multi_reduction <add>, %311, %cst_148 [1] : vector<16x32xf32> to vector<16xf32>
    %317 = vector.shape_cast %316 : vector<16xf32> to vector<16x1xf32>
    %cst_149 = arith.constant 3.200000e+01 : f32
    %318 = vector.broadcast %cst_149 : f32 to vector<16x1xf32>
    %319 = arith.divf %317, %318 : vector<16x1xf32>
    %320 = vector.broadcast %319 : vector<16x1xf32> to vector<16x32xf32>
    %321 = arith.subf %311, %320 : vector<16x32xf32>
    %322 = arith.mulf %321, %321 : vector<16x32xf32>
    %cst_150 = arith.constant dense<0.000000e+00> : vector<16xf32>
    %323 = vector.multi_reduction <add>, %322, %cst_150 [1] : vector<16x32xf32> to vector<16xf32>
    %324 = vector.shape_cast %323 : vector<16xf32> to vector<16x1xf32>
    %cst_151 = arith.constant 3.200000e+01 : f32
    %325 = vector.broadcast %cst_151 : f32 to vector<16x1xf32>
    %326 = arith.divf %324, %325 : vector<16x1xf32>
    %327 = vector.broadcast %319 : vector<16x1xf32> to vector<16x32xf32>
    %328 = arith.subf %311, %327 : vector<16x32xf32>
    %cst_152 = arith.constant 9.99999974E-6 : f32
    %329 = vector.broadcast %cst_152 : f32 to vector<16x1xf32>
    %330 = arith.addf %326, %329 : vector<16x1xf32>
    %331 = math.rsqrt %330 : vector<16x1xf32>
    %332 = vector.broadcast %331 : vector<16x1xf32> to vector<16x32xf32>
    %333 = arith.mulf %328, %332 : vector<16x32xf32>
    %334 = vector.broadcast %313 : vector<1x32xf32> to vector<16x32xf32>
    %335 = arith.mulf %333, %334 : vector<16x32xf32>
    %336 = vector.broadcast %315 : vector<1x32xf32> to vector<16x32xf32>
    %337 = arith.addf %335, %336 : vector<16x32xf32>
    %c1_153 = arith.constant 1 : index
    %c0_154 = arith.constant 0 : index
    %c0_155 = arith.constant 0 : index
    %338 = vector.load %arg6[%c1_153, %c0_154, %c0_155] : memref<2x32x64xf32, #tpu.memory_space<vmem>>, vector<1x32x64xf32>
    %339 = vector.shape_cast %338 : vector<1x32x64xf32> to vector<32x64xf32>
    %cst_156 = arith.constant dense<0.000000e+00> : vector<16x64xf32>
    %340 = tpu.matmul %337, %339, %cst_156 {dimension_numbers = #tpu.dot_dimension_numbers<[1], [0], [0], [1], [0, 0, 1, 1], [], []>} : vector<16x32xf32>, vector<32x64xf32>, vector<16x64xf32> -> vector<16x64xf32>
    %c1_157 = arith.constant 1 : index
    %c0_158 = arith.constant 0 : index
    %c0_159 = arith.constant 0 : index
    %341 = vector.load %arg7[%c1_157, %c0_158, %c0_159] : memref<2x1x64xf32, #tpu.memory_space<vmem>>, vector<1x1x64xf32>
    %342 = vector.shape_cast %341 : vector<1x1x64xf32> to vector<1x64xf32>
    %343 = vector.broadcast %342 : vector<1x64xf32> to vector<16x64xf32>
    %344 = arith.addf %340, %343 : vector<16x64xf32>
    %cst_160 = arith.constant 5.000000e-01 : f32
    %345 = vector.broadcast %cst_160 : f32 to vector<16x64xf32>
    %346 = arith.mulf %345, %344 : vector<16x64xf32>
    %cst_161 = arith.constant 0.707106769 : f32
    %347 = vector.broadcast %cst_161 : f32 to vector<16x64xf32>
    %348 = arith.mulf %344, %347 : vector<16x64xf32>
    %349 = math.absf %348 : vector<16x64xf32>
    %cst_162 = arith.constant 0.327591091 : f32
    %350 = vector.broadcast %cst_162 : f32 to vector<16x64xf32>
    %351 = arith.mulf %350, %349 : vector<16x64xf32>
    %cst_163 = arith.constant 1.000000e+00 : f32
    %352 = vector.broadcast %cst_163 : f32 to vector<16x64xf32>
    %353 = arith.addf %352, %351 : vector<16x64xf32>
    %cst_164 = arith.constant 1.000000e+00 : f32
    %354 = vector.broadcast %cst_164 : f32 to vector<16x64xf32>
    %355 = arith.divf %354, %353 : vector<16x64xf32>
    %cst_165 = arith.constant 1.06140542 : f32
    %356 = vector.broadcast %cst_165 : f32 to vector<16x64xf32>
    %357 = arith.mulf %356, %355 : vector<16x64xf32>
    %cst_166 = arith.constant -1.45315206 : f32
    %358 = vector.broadcast %cst_166 : f32 to vector<16x64xf32>
    %359 = arith.addf %357, %358 : vector<16x64xf32>
    %360 = arith.mulf %359, %355 : vector<16x64xf32>
    %cst_167 = arith.constant 1.42141378 : f32
    %361 = vector.broadcast %cst_167 : f32 to vector<16x64xf32>
    %362 = arith.addf %360, %361 : vector<16x64xf32>
    %363 = arith.mulf %362, %355 : vector<16x64xf32>
    %cst_168 = arith.constant -0.284496725 : f32
    %364 = vector.broadcast %cst_168 : f32 to vector<16x64xf32>
    %365 = arith.addf %363, %364 : vector<16x64xf32>
    %366 = arith.mulf %365, %355 : vector<16x64xf32>
    %cst_169 = arith.constant 0.254829586 : f32
    %367 = vector.broadcast %cst_169 : f32 to vector<16x64xf32>
    %368 = arith.addf %366, %367 : vector<16x64xf32>
    %369 = arith.mulf %368, %355 : vector<16x64xf32>
    %cst_170 = arith.constant 0.000000e+00 : f32
    %370 = vector.broadcast %cst_170 : f32 to vector<16x64xf32>
    %371 = arith.subf %370, %349 : vector<16x64xf32>
    %372 = arith.mulf %371, %349 : vector<16x64xf32>
    %373 = math.exp %372 : vector<16x64xf32>
    %374 = arith.mulf %369, %373 : vector<16x64xf32>
    %cst_171 = arith.constant 1.000000e+00 : f32
    %375 = vector.broadcast %cst_171 : f32 to vector<16x64xf32>
    %376 = arith.subf %375, %374 : vector<16x64xf32>
    %cst_172 = arith.constant 0.000000e+00 : f32
    %377 = vector.broadcast %cst_172 : f32 to vector<16x64xf32>
    %378 = arith.cmpf oge, %348, %377 : vector<16x64xf32>
    %cst_173 = arith.constant 0.000000e+00 : f32
    %379 = vector.broadcast %cst_173 : f32 to vector<16x64xf32>
    %380 = arith.subf %379, %376 : vector<16x64xf32>
    %381 = arith.select %378, %376, %380 : vector<16x64xi1>, vector<16x64xf32>
    %cst_174 = arith.constant 1.000000e+00 : f32
    %382 = vector.broadcast %cst_174 : f32 to vector<16x64xf32>
    %383 = arith.addf %382, %381 : vector<16x64xf32>
    %384 = arith.mulf %346, %383 : vector<16x64xf32>
    %c1_175 = arith.constant 1 : index
    %c0_176 = arith.constant 0 : index
    %c0_177 = arith.constant 0 : index
    %385 = vector.load %arg8[%c1_175, %c0_176, %c0_177] : memref<2x64x32xf32, #tpu.memory_space<vmem>>, vector<1x64x32xf32>
    %386 = vector.shape_cast %385 : vector<1x64x32xf32> to vector<64x32xf32>
    %cst_178 = arith.constant dense<0.000000e+00> : vector<16x32xf32>
    %387 = tpu.matmul %384, %386, %cst_178 {dimension_numbers = #tpu.dot_dimension_numbers<[1], [0], [0], [1], [0, 0, 1, 1], [], []>} : vector<16x64xf32>, vector<64x32xf32>, vector<16x32xf32> -> vector<16x32xf32>
    %c1_179 = arith.constant 1 : index
    %c0_180 = arith.constant 0 : index
    %c0_181 = arith.constant 0 : index
    %388 = vector.load %arg9[%c1_179, %c0_180, %c0_181] : memref<2x1x32xf32, #tpu.memory_space<vmem>>, vector<1x1x32xf32>
    %389 = vector.shape_cast %388 : vector<1x1x32xf32> to vector<1x32xf32>
    %390 = vector.broadcast %389 : vector<1x32xf32> to vector<16x32xf32>
    %391 = arith.addf %387, %390 : vector<16x32xf32>
    %392 = arith.addf %337, %391 : vector<16x32xf32>
    %c1_182 = arith.constant 1 : index
    %c0_183 = arith.constant 0 : index
    %c0_184 = arith.constant 0 : index
    %393 = vector.load %arg12[%c1_182, %c0_183, %c0_184] : memref<2x1x32xf32, #tpu.memory_space<vmem>>, vector<1x1x32xf32>
    %394 = vector.shape_cast %393 : vector<1x1x32xf32> to vector<1x32xf32>
    %c1_185 = arith.constant 1 : index
    %c0_186 = arith.constant 0 : index
    %c0_187 = arith.constant 0 : index
    %395 = vector.load %arg13[%c1_185, %c0_186, %c0_187] : memref<2x1x32xf32, #tpu.memory_space<vmem>>, vector<1x1x32xf32>
    %396 = vector.shape_cast %395 : vector<1x1x32xf32> to vector<1x32xf32>
    %cst_188 = arith.constant dense<0.000000e+00> : vector<16xf32>
    %397 = vector.multi_reduction <add>, %392, %cst_188 [1] : vector<16x32xf32> to vector<16xf32>
    %398 = vector.shape_cast %397 : vector<16xf32> to vector<16x1xf32>
    %cst_189 = arith.constant 3.200000e+01 : f32
    %399 = vector.broadcast %cst_189 : f32 to vector<16x1xf32>
    %400 = arith.divf %398, %399 : vector<16x1xf32>
    %401 = vector.broadcast %400 : vector<16x1xf32> to vector<16x32xf32>
    %402 = arith.subf %392, %401 : vector<16x32xf32>
    %403 = arith.mulf %402, %402 : vector<16x32xf32>
    %cst_190 = arith.constant dense<0.000000e+00> : vector<16xf32>
    %404 = vector.multi_reduction <add>, %403, %cst_190 [1] : vector<16x32xf32> to vector<16xf32>
    %405 = vector.shape_cast %404 : vector<16xf32> to vector<16x1xf32>
    %cst_191 = arith.constant 3.200000e+01 : f32
    %406 = vector.broadcast %cst_191 : f32 to vector<16x1xf32>
    %407 = arith.divf %405, %406 : vector<16x1xf32>
    %408 = vector.broadcast %400 : vector<16x1xf32> to vector<16x32xf32>
    %409 = arith.subf %392, %408 : vector<16x32xf32>
    %cst_192 = arith.constant 9.99999974E-6 : f32
    %410 = vector.broadcast %cst_192 : f32 to vector<16x1xf32>
    %411 = arith.addf %407, %410 : vector<16x1xf32>
    %412 = math.rsqrt %411 : vector<16x1xf32>
    %413 = vector.broadcast %412 : vector<16x1xf32> to vector<16x32xf32>
    %414 = arith.mulf %409, %413 : vector<16x32xf32>
    %415 = vector.broadcast %394 : vector<1x32xf32> to vector<16x32xf32>
    %416 = arith.mulf %414, %415 : vector<16x32xf32>
    %417 = vector.broadcast %396 : vector<1x32xf32> to vector<16x32xf32>
    %418 = arith.addf %416, %417 : vector<16x32xf32>
    %419 = vector.shape_cast %418 : vector<16x32xf32> to vector<2x8x32xf32>
    %420 = vector.shape_cast %419 : vector<2x8x32xf32> to vector<16x32xf32>
    %c0_193 = arith.constant 0 : index
    %c0_194 = arith.constant 0 : index
    %421 = vector.load %arg14[%c0_193, %c0_194] : memref<32x128xf32, #tpu.memory_space<vmem>>, vector<32x128xf32>
    %cst_195 = arith.constant dense<0.000000e+00> : vector<16x128xf32>
    %422 = tpu.matmul %420, %421, %cst_195 {dimension_numbers = #tpu.dot_dimension_numbers<[1], [0], [0], [1], [0, 0, 1, 1], [], []>} : vector<16x32xf32>, vector<32x128xf32>, vector<16x128xf32> -> vector<16x128xf32>
    %c0_196 = arith.constant 0 : index
    %c0_197 = arith.constant 0 : index
    %423 = vector.load %arg15[%c0_196, %c0_197] : memref<1x128xf32, #tpu.memory_space<vmem>>, vector<1x128xf32>
    %424 = vector.broadcast %423 : vector<1x128xf32> to vector<16x128xf32>
    %425 = arith.addf %422, %424 : vector<16x128xf32>
    %426 = vector.shape_cast %425 : vector<16x128xf32> to vector<2x8x128xf32>
    %c0_198 = arith.constant 0 : index
    %c0_199 = arith.constant 0 : index
    %c0_200 = arith.constant 0 : index
    %427 = vector.load %arg16[%c0_198, %c0_199, %c0_200] : memref<2x8x128xf32, #tpu.memory_space<vmem>>, vector<2x8x128xf32>
    tpu.vector_store %arg16[%c0_198, %c0_199, %c0_200], %426 {strides = array<i32>} : memref<2x8x128xf32, #tpu.memory_space<vmem>>, vector<2x8x128xf32>,
    return
  }
  func.func @transform_0(%arg0: i32) -> (i32, i32, i32) {
    %c0_i32 = arith.constant 0 : i32
    %c0_i32_0 = arith.constant 0 : i32
    %c0_i32_1 = arith.constant 0 : i32
    return %arg0, %c0_i32, %c0_i32_0 : i32, i32, i32
  }
  func.func @transform_1(%arg0: i32) -> (i32, i32, i32) {
    %c0_i32 = arith.constant 0 : i32
    %c0_i32_0 = arith.constant 0 : i32
    %c0_i32_1 = arith.constant 0 : i32
    %c0_i32_2 = arith.constant 0 : i32
    return %c0_i32, %c0_i32_0, %c0_i32_1 : i32, i32, i32
  }
  func.func @transform_2(%arg0: i32) -> (i32, i32, i32) {
    %c0_i32 = arith.constant 0 : i32
    %c0_i32_0 = arith.constant 0 : i32
    %c0_i32_1 = arith.constant 0 : i32
    %c0_i32_2 = arith.constant 0 : i32
    return %c0_i32, %c0_i32_0, %c0_i32_1 : i32, i32, i32
  }
  func.func @transform_3(%arg0: i32) -> (i32, i32, i32) {
    %c0_i32 = arith.constant 0 : i32
    %c0_i32_0 = arith.constant 0 : i32
    %c0_i32_1 = arith.constant 0 : i32
    %c0_i32_2 = arith.constant 0 : i32
    return %c0_i32, %c0_i32_0, %c0_i32_1 : i32, i32, i32
  }
  func.func @transform_4(%arg0: i32) -> (i32, i32, i32) {
    %c0_i32 = arith.constant 0 : i32
    %c0_i32_0 = arith.constant 0 : i32
    %c0_i32_1 = arith.constant 0 : i32
    %c0_i32_2 = arith.constant 0 : i32
    return %c0_i32, %c0_i32_0, %c0_i32_1 : i32, i32, i32
  }
  func.func @transform_5(%arg0: i32) -> (i32, i32, i32) {
    %c0_i32 = arith.constant 0 : i32
    %c0_i32_0 = arith.constant 0 : i32
    %c0_i32_1 = arith.constant 0 : i32
    %c0_i32_2 = arith.constant 0 : i32
    return %c0_i32, %c0_i32_0, %c0_i32_1 : i32, i32, i32
  }
  func.func @transform_6(%arg0: i32) -> (i32, i32, i32) {
    %c0_i32 = arith.constant 0 : i32
    %c0_i32_0 = arith.constant 0 : i32
    %c0_i32_1 = arith.constant 0 : i32
    %c0_i32_2 = arith.constant 0 : i32
    return %c0_i32, %c0_i32_0, %c0_i32_1 : i32, i32, i32
  }
  func.func @transform_7(%arg0: i32) -> (i32, i32, i32) {
    %c0_i32 = arith.constant 0 : i32
    %c0_i32_0 = arith.constant 0 : i32
    %c0_i32_1 = arith.constant 0 : i32
    %c0_i32_2 = arith.constant 0 : i32
    return %c0_i32, %c0_i32_0, %c0_i32_1 : i32, i32, i32
  }
  func.func @transform_8(%arg0: i32) -> (i32, i32, i32) {
    %c0_i32 = arith.constant 0 : i32
    %c0_i32_0 = arith.constant 0 : i32
    %c0_i32_1 = arith.constant 0 : i32
    %c0_i32_2 = arith.constant 0 : i32
    return %c0_i32, %c0_i32_0, %c0_i32_1 : i32, i32, i32
  }
  func.func @transform_9(%arg0: i32) -> (i32, i32, i32) {
    %c0_i32 = arith.constant 0 : i32
    %c0_i32_0 = arith.constant 0 : i32
    %c0_i32_1 = arith.constant 0 : i32
    %c0_i32_2 = arith.constant 0 : i32
    return %c0_i32, %c0_i32_0, %c0_i32_1 : i32, i32, i32
  }
  func.func @transform_10(%arg0: i32) -> (i32, i32, i32) {
    %c0_i32 = arith.constant 0 : i32
    %c0_i32_0 = arith.constant 0 : i32
    %c0_i32_1 = arith.constant 0 : i32
    %c0_i32_2 = arith.constant 0 : i32
    return %c0_i32, %c0_i32_0, %c0_i32_1 : i32, i32, i32
  }
  func.func @transform_11(%arg0: i32) -> (i32, i32, i32) {
    %c0_i32 = arith.constant 0 : i32
    %c0_i32_0 = arith.constant 0 : i32
    %c0_i32_1 = arith.constant 0 : i32
    %c0_i32_2 = arith.constant 0 : i32
    return %c0_i32, %c0_i32_0, %c0_i32_1 : i32, i32, i32
  }
  func.func @transform_12(%arg0: i32) -> (i32, i32, i32) {
    %c0_i32 = arith.constant 0 : i32
    %c0_i32_0 = arith.constant 0 : i32
    %c0_i32_1 = arith.constant 0 : i32
    %c0_i32_2 = arith.constant 0 : i32
    return %c0_i32, %c0_i32_0, %c0_i32_1 : i32, i32, i32
  }
  func.func @transform_13(%arg0: i32) -> (i32, i32) {
    %c0_i32 = arith.constant 0 : i32
    %c0_i32_0 = arith.constant 0 : i32
    %c0_i32_1 = arith.constant 0 : i32
    return %c0_i32, %c0_i32_0 : i32, i32
  }
  func.func @transform_14(%arg0: i32) -> (i32, i32) {
    %c0_i32 = arith.constant 0 : i32
    %c0_i32_0 = arith.constant 0 : i32
    %c0_i32_1 = arith.constant 0 : i32
    return %c0_i32, %c0_i32_0 : i32, i32
  }
  func.func @transform_15(%arg0: i32) -> (i32, i32, i32) {
    %c0_i32 = arith.constant 0 : i32
    %c0_i32_0 = arith.constant 0 : i32
    %c0_i32_1 = arith.constant 0 : i32
    return %arg0, %c0_i32, %c0_i32_0 : i32, i32, i32
  }
}

</mosaic_0001>

<bundles_post_ra>
// kernel: simple_gpt_forward.1
= control target key start
LH: loop header
LB: loop body
LE: loop exit
PB: predicated region body
PF: predicated region fallthrough
CT: control target
= control target key end

     0   :  { %vm70_vm0 = vcmask 261120   ;;  %s5288_s0 = inlined_call_operand.vmem [shape: f32[2,8,32], index: 0, kind: input, shape index: {}]   ;;  %s5289_s1 = inlined_call_operand.vmem [shape: f32[2,32,96], index: 1, kind: input, shape index: {}]   ;;  %s5290_s2 = inlined_call_operand.vmem [shape: f32[2,1,96], index: 2, kind: input, shape index: {}]   ;;  %s5291_s3 = inlined_call_operand.vmem [shape: f32[2,32,32], index: 3, kind: input, shape index: {}]   ;;  %s5292_s4 = inlined_call_operand.vmem [shape: f32[2,1,32], index: 4, kind: input, shape index: {}]   ;;  %s5293_s5 = inlined_call_operand.vmem [shape: f32[2,32,64], index: 5, kind: input, shape index: {}]   ;;  %s5294_s6 = inlined_call_operand.vmem [shape: f32[2,1,64], index: 6, kind: input, shape index: {}]   ;;  %s5295_s7 = inlined_call_operand.vmem [shape: f32[2,64,32], index: 7, kind: input, shape index: {}]   ;;  %s5296_s8 = inlined_call_operand.vmem [shape: f32[2,1,32], index: 8, kind: input, shape index: {}]   ;;  %s5297_s9 = inlined_call_operand.vmem [shape: f32[2,1,32], index: 9, kind: input, shape index: {}]   ;;  %s5298_s10 = inlined_call_operand.vmem [shape: f32[2,1,32], index: 10, kind: input, shape index: {}]   ;;  %s5299_s11 = inlined_call_operand.vmem [shape: f32[2,1,32], index: 11, kind: input, shape index: {}]   ;;  %s5300_s12 = inlined_call_operand.vmem [shape: f32[2,1,32], index: 12, kind: input, shape index: {}]   ;;  %s5301_s13 = inlined_call_operand.vmem [shape: f32[32,128], index: 13, kind: input, shape index: {}]   ;;  %s5302_s14 = inlined_call_operand.vmem [shape: f32[1,128], index: 14, kind: input, shape index: {}]   ;;  %s5303_s15 = inlined_call_operand.hbm [shape: f32[2,8,128], index: 15, kind: output, shape index: {}]  }
   0x1   :  { %v62_v0 = vld [vmem:[%s5289_s1 + $0x18] sm:$0xff]  ;;  %v61_v1 = vld [vmem:[%s5289_s1 + $0x10] sm:$0xff]  ;;  %v4691_v2 = vld [vmem:[%s5288_s0] sm:$0xff] }
   0x2   :  { %4173 = vmatprep.subr.mxu0 %v62_v0  ;;  %v60_v3 = vld [vmem:[%s5289_s1 + $0x8] sm:$0xff]  ;;  %4181 = vmatprep.mubr.msk.f32.mxu0 %vm70_vm0, %v4691_v2 }
   0x3   :  { %4174 = vmatpush3.msra.mxu0 %v62_v0 }
   0x4   :  { %20 = vsyncpa [#allocation4], 0  ;;  %4175 = vmatprep.subr.mxu0 %v61_v1  ;;  %v59_v4 = vld [vmem:[%s5289_s1] sm:$0xff]  ;;  %v4704_v5 = vld [vmem:[%s5288_s0 + $0x8] sm:$0xff]  ;;  %v4584_v6 = vmov 0.0   ;;  %vm4585_vm1 = vmmov 0   ;;  %v51_v16 = vlaneseq }
   0x5   :  { %4176 = vmatpush3.msra.mxu0 %v61_v1  ;;  %4184 = vmatprep.subr.mxu1 %v4584_v6  ;;  %v3936_v8 = vld [vmem:[%s5290_s2] ss:$0 sm:$0xff]  ;;  %s4586_s16 = smov 96   ;;  %vm157_vm2 = vcmask 64512   ;;  %s4587_s17 = smov 64   ;;  %vm825_vm4 = vcmask 130112  }
   0x6   :  { %4177 = vmatprep.subr.mxu0 %v60_v3  ;;  %4186 = vmatprep.mubr.msk.f32.mxu1 %vm4585_vm1, %v4584_v6  ;;  %v52_v17 = vshrl.u32 %v51_v16, 7  ;;  %v54_v18 = vand.u32 127, %v51_v16  ;;  %s4588_s18 = smov 88   ;;  %s4589_s19 = smov 120   ;;  %vm1166_vm5 = vcmask 195712   ;;  %vm1507_vm6 = vcmask 261312  }
   0x7   :  { %4178 = vmatpush3.msra.mxu0 %v60_v3  ;;  %s4590_s20 = smov 56   ;;  %s4591_s21 = smov 112   ;;  %vm1812_vm9 = vcmask 523264  }
   0x8   :  { %4179 = vmatprep.subr.mxu0 %v59_v4  ;;  %vm55_vm3 = vcmp.gt.s32.totalorder %v54_v18, %v52_v17  ;;  %s4592_s22 = smov 80   ;;  %s5314_s23 = smov 48  }
   0x9   :  { %4180 = vmatpush3.msra.mxu0 %v59_v4  ;;  %v4744_v19 = vsel %vm55_vm3, -1e+30, %v4584_v6  ;;  %s5312_s24 = smov 72   ;;  %s5310_s25 = smov 104  }
   0xa   :  { %4182 = vmatmul.mubr.msk.f32.vlgmr.msra.gmra.mxu0 %vm70_vm0, %v4704_v5  ;;  %4204 = vmatprep.subr.mxu0 %v4584_v6  ;;  %s5308_s26 = smov 40   ;;  %s5306_s27 = smov 8  }
   0xb   :  { %4206 = vmatprep.mubr.msk.f32.mxu0 %vm4585_vm1, %v4584_v6  ;;  %s5304_s28 = smov 16   ;;  %s4599_s29 = smov 24  }
  0xca   :  { %v4183_v7 = vpop.f32.mrf.mxu0 }
  0xcb   :  { %v4721_v11 = vadd.f32 %v4183_v7, %v3936_v8 }
  0xcc   :  { %v143_v9 = vpop.f32.mrf.mxu0 }
  0xcd   :  { %v4717_v10 = vadd.f32 %v3936_v8, %v143_v9  ;;  %v4736_v15 = vmul.f32 0.35355338, %v4721_v11 }
  0xcf   :  { %155 = vrot.lane.b32.xlu0 %v4717_v10, %s4586_s16  ;;  %v4727_v13 = vmul.f32 0.35355338, %v4717_v10 }
  0xd3   :  { %234 = vrot.lane.b32.xlu0 %v4721_v11, %s4586_s16 }
 0x141   :  { %v156_v12 = vpop.permute.xlu0 %155 }
 0x142   :  { %4185 = vmatpush3.xpose.msk.msra.mxu1 %vm157_vm2, %v156_v12 }
 0x143   :  { %4189 = vmatprep.subr.mxu1 %v4584_v6 }
 0x145   :  { %v235_v14 = vpop.permute.xlu0 %234  ;;  %4187 = vmatmul.mubr.msk.f32.vlgmr.msra.gmra.mxu1 %vm157_vm2, %v4727_v13 }
 0x146   :  { %4190 = vmatpush3.xpose.msk.msra.mxu1 %vm157_vm2, %v235_v14  ;;  %4191 = vmatprep.mubr.msk.f32.mxu1 %vm4585_vm1, %v4584_v6 }
 0x147   :  { %4194 = vmatprep.subr.mxu1 %v4584_v6 }
 0x149   :  { %4192 = vmatmul.mubr.msk.f32.vlgmr.msra.gmra.mxu1 %vm157_vm2, %v4736_v15 }
 0x14a   :  { %4196 = vmatprep.mubr.msk.f32.mxu1 %vm4585_vm1, %v4584_v6 }
 0x205   :  { %v229_v20 = vpop.f32.mrf.mxu1 }
 0x206   :  { %v230_v21 = vadd.f32 %v229_v20, %v4744_v19 }
 0x207   :  { %v4188_v22 = vpop.f32.mrf.mxu1 }
 0x208   :  { %v311_v23 = vsel %vm157_vm2, %v230_v21, -inf }
 0x209   :  { %v307_v24 = vpop.f32.mrf.mxu1  ;;  %312 = vmax.xlane.f32.xlu1 %v311_v23 }
 0x20a   :  { %v308_v25 = vadd.f32 %v307_v24, %v4744_v19 }
 0x20b   :  { %v4193_v26 = vpop.f32.mrf.mxu1 }
 0x20c   :  { %v314_v27 = vsel %vm157_vm2, %v308_v25, -inf }
 0x20d   :  { %315 = vmax.xlane.f32.xlu1 %v314_v27 }
 0x21e   :  { %333 = vrot.lane.b32.xlu1 %v4717_v10, %s4587_s17 }
 0x222   :  { %409 = vrot.lane.b32.xlu1 %v4721_v11, %s4587_s17 }
 0x226   :  { %489 = vrot.lane.b32.xlu1 %v4717_v10, %s4588_s18 }
 0x22a   :  { %567 = vrot.lane.b32.xlu1 %v4721_v11, %s4588_s18 }
 0x292   :  { %v313_v28 = vpop.xlane.xlu1 %312 }
 0x293   :  { %v317_v29 = vsub.f32 %v230_v21, %v313_v28 }
 0x295   :  { %v319_v30 = vmul.f32 1.442695, %v317_v29 }
 0x296   :  { %v316_v31 = vpop.xlane.xlu1 %315 }
 0x297   :  { %4466 = vpow2.f32 %v319_v30  ;;  %v318_v32 = vsub.f32 %v308_v25, %v316_v31 }
 0x299   :  { %v321_v33 = vmul.f32 1.442695, %v318_v32 }
 0x29a   :  { %v334_v34 = vpop.permute.xlu1 %333 }
 0x29b   :  { %4468 = vpow2.f32 %v321_v33  ;;  %4195 = vmatpush3.msra.mxu1 %v334_v34 }
 0x29c   :  { %4199 = vmatprep.subr.mxu1 %v4584_v6 }
 0x29e   :  { %v410_v35 = vpop.permute.xlu1 %409 }
 0x2a2   :  { %v490_v36 = vpop.permute.xlu1 %489 }
 0x2a3   :  { %4205 = vmatpush3.xpose.msk.msra.mxu0 %vm157_vm2, %v490_v36 }
 0x2a4   :  { %v4467_v37 = vpop.eup %4466  ;;  %4214 = vmatprep.subr.mxu0 %v4584_v6 }
 0x2a5   :  { %v323_v38 = vsel %vm157_vm2, %v4467_v37, 0.0 }
 0x2a6   :  { %324 = vadd.xlane.f32.xlu0 %v323_v38  ;;  %v568_v41 = vpop.permute.xlu1 %567 }
 0x2a8   :  { %v4469_v39 = vpop.eup %4468 }
 0x2a9   :  { %v326_v40 = vsel %vm157_vm2, %v4469_v39, 0.0 }
 0x2aa   :  { %327 = vadd.xlane.f32.xlu1 %v326_v40 }
 0x2bb   :  { %565 = vrot.lane.b32.xlu1 %v4736_v15, %s4589_s19 }
 0x2bc   :  { %487 = vrot.lane.b32.xlu0 %v4727_v13, %s4589_s19 }
 0x32f   :  { %v325_v42 = vpop.xlane.xlu0 %324 }
 0x330   :  { %4470 = vrcp.f32 %v325_v42 }
 0x333   :  { %v488_v43 = vpop.permute.xlu0 %487  ;;  %v328_v44 = vpop.xlane.xlu1 %327 }
 0x334   :  { %4472 = vrcp.f32 %v328_v44  ;;  %4207 = vmatmul.mubr.msk.f32.vlgmr.msra.gmra.mxu0 %vm157_vm2, %v488_v43 }
 0x335   :  { %4216 = vmatprep.mubr.msk.f32.mxu0 %vm4585_vm1, %v4584_v6 }
 0x337   :  { %v566_v49 = vpop.permute.xlu1 %565 }
 0x33d   :  { %v4471_v45 = vpop.eup %4470 }
 0x33e   :  { %v331_v46 = vmul.f32 %v4471_v45, %v4467_v37 }
 0x340   :  { %4197 = vmatmul.mubr.msk.f32.vlgmr.msra.gmra.mxu1 %vm157_vm2, %v331_v46 }
 0x341   :  { %v4473_v47 = vpop.eup %4472  ;;  %4200 = vmatpush3.msra.mxu1 %v410_v35  ;;  %4201 = vmatprep.mubr.msk.f32.mxu1 %vm4585_vm1, %v4584_v6 }
 0x342   :  { %4209 = vmatprep.subr.mxu1 %v4584_v6  ;;  %v332_v48 = vmul.f32 %v4473_v47, %v4469_v39 }
 0x344   :  { %4202 = vmatmul.mubr.msk.f32.vlgmr.msra.gmra.mxu1 %vm157_vm2, %v332_v48 }
 0x345   :  { %4210 = vmatpush3.xpose.msk.msra.mxu1 %vm157_vm2, %v568_v41  ;;  %4211 = vmatprep.mubr.msk.f32.mxu1 %vm4585_vm1, %v4584_v6 }
 0x346   :  { %4219 = vmatprep.subr.mxu1 %v4584_v6 }
 0x348   :  { %4212 = vmatmul.mubr.msk.f32.vlgmr.msra.gmra.mxu1 %vm157_vm2, %v566_v49 }
 0x349   :  { %4221 = vmatprep.mubr.msk.f32.mxu1 %vm4585_vm1, %v4584_v6 }
 0x3f4   :  { %v561_v50 = vpop.f32.mrf.mxu0 }
 0x3f5   :  { %v562_v51 = vadd.f32 %v561_v50, %v4744_v19 }
 0x3f6   :  { %v4208_v52 = vpop.f32.mrf.mxu0 }
 0x3f7   :  { %v643_v53 = vsel %vm157_vm2, %v562_v51, -inf }
 0x3f8   :  { %644 = vmax.xlane.f32.xlu1 %v643_v53 }
 0x400   :  { %v405_v54 = vpop.f32.mrf.mxu1 }
 0x401   :  { %485 = vst.msk [vmem:[#allocation2] sm:$0xff] %vm157_vm2, %v405_v54 }
 0x402   :  { %v4198_v55 = vpop.f32.mrf.mxu1 }
 0x404   :  { %v481_v56 = vpop.f32.mrf.mxu1 }
 0x405   :  { %486 = vst.msk [vmem:[#allocation2 + $0x8] sm:$0xff] %vm157_vm2, %v481_v56 }
 0x406   :  { %v4203_v57 = vpop.f32.mrf.mxu1 }
 0x408   :  { %v639_v58 = vpop.f32.mrf.mxu1 }
 0x409   :  { %v640_v59 = vadd.f32 %v639_v58, %v4744_v19 }
 0x40a   :  { %v4213_v60 = vpop.f32.mrf.mxu1 }
 0x40b   :  { %v646_v61 = vsel %vm157_vm2, %v640_v59, -inf }
 0x40c   :  { %647 = vmax.xlane.f32.xlu0 %v646_v61 }
 0x422   :  { %741 = vrot.lane.b32.xlu0 %v4721_v11, %s4590_s20 }
 0x426   :  { %828 = vrot.lane.b32.xlu0 %v4727_v13, %s4591_s21 }
 0x481   :  { %v645_v62 = vpop.xlane.xlu1 %644 }
 0x482   :  { %v649_v63 = vsub.f32 %v562_v51, %v645_v62 }
 0x484   :  { %v651_v0 = vmul.f32 1.442695, %v649_v63 }
 0x486   :  { %4474 = vpow2.f32 %v651_v0 }
 0x493   :  { %v4475_v1 = vpop.eup %4474 }
 0x494   :  { %v655_v3 = vsel %vm157_vm2, %v4475_v1, 0.0 }
 0x495   :  { %v648_v4 = vpop.xlane.xlu0 %647  ;;  %656 = vadd.xlane.f32.xlu1 %v655_v3 }
 0x496   :  { %v650_v8 = vsub.f32 %v640_v59, %v648_v4 }
 0x498   :  { %v653_v9 = vmul.f32 1.442695, %v650_v8 }
 0x499   :  { %v742_v7 = vpop.permute.xlu0 %741 }
 0x49a   :  { %4220 = vmatpush3.msra.mxu1 %v742_v7  ;;  %4476 = vpow2.f32 %v653_v9 }
 0x49b   :  { %4229 = vmatprep.subr.mxu1 %v4584_v6 }
 0x49d   :  { %v829_v22 = vpop.permute.xlu0 %828 }
 0x4a6   :  { %665 = vrot.lane.b32.xlu1 %v4717_v10, %s4590_s20 }
 0x4a7   :  { %v4477_v12 = vpop.eup %4476 }
 0x4a8   :  { %v658_v14 = vsel %vm157_vm2, %v4477_v12, 0.0 }
 0x4aa   :  { %830 = vrot.lane.b32.xlu1 %v4717_v10, %s4592_s22 }
 0x4ae   :  { %908 = vrot.lane.b32.xlu1 %v4721_v11, %s4592_s22 }
 0x4d2   :  { %659 = vadd.xlane.f32.xlu1 %v658_v14 }
 0x4e3   :  { %906 = vrot.lane.b32.xlu1 %v4736_v15, %s4591_s21 }
 0x51e   :  { %v657_v16 = vpop.xlane.xlu1 %656 }
 0x51f   :  { %4478 = vrcp.f32 %v657_v16 }
 0x522   :  { %v666_v17 = vpop.permute.xlu1 %665 }
 0x523   :  { %4215 = vmatpush3.msra.mxu0 %v666_v17 }
 0x524   :  { %4224 = vmatprep.subr.mxu0 %v4584_v6 }
 0x526   :  { %v831_v21 = vpop.permute.xlu1 %830 }
 0x52a   :  { %v909_v23 = vpop.permute.xlu1 %908 }
 0x52c   :  { %v4479_v18 = vpop.eup %4478 }
 0x52d   :  { %v663_v20 = vmul.f32 %v4479_v18, %v4475_v1 }
 0x52f   :  { %4217 = vmatmul.mubr.msk.f32.vlgmr.msra.gmra.mxu0 %vm157_vm2, %v663_v20 }
 0x530   :  { %4225 = vmatpush3.xpose.msk.msra.mxu0 %vm157_vm2, %v831_v21  ;;  %4226 = vmatprep.mubr.msk.f32.mxu0 %vm4585_vm1, %v4584_v6 }
 0x531   :  { %4234 = vmatprep.subr.mxu0 %v4584_v6 }
 0x533   :  { %4227 = vmatmul.mubr.msk.f32.vlgmr.msra.gmra.mxu0 %vm157_vm2, %v829_v22 }
 0x534   :  { %4236 = vmatprep.mubr.msk.f32.mxu0 %vm4585_vm1, %v4584_v6 }
 0x55b   :  { %v660_v24 = vpop.xlane.xlu1 %659 }
 0x55c   :  { %4480 = vrcp.f32 %v660_v24 }
 0x55f   :  { %v907_v27 = vpop.permute.xlu1 %906 }
 0x569   :  { %v4481_v25 = vpop.eup %4480 }
 0x56a   :  { %v664_v26 = vmul.f32 %v4481_v25, %v4477_v12 }
 0x56c   :  { %4222 = vmatmul.mubr.msk.f32.vlgmr.msra.gmra.mxu1 %vm157_vm2, %v664_v26 }
 0x56d   :  { %4230 = vmatpush3.xpose.msk.msra.mxu1 %vm157_vm2, %v909_v23  ;;  %4231 = vmatprep.mubr.msk.f32.mxu1 %vm4585_vm1, %v4584_v6 }
 0x56e   :  { %4239 = vmatprep.subr.mxu1 %v4584_v6 }
 0x570   :  { %4232 = vmatmul.mubr.msk.f32.vlgmr.msra.gmra.mxu1 %vm157_vm2, %v907_v27 }
 0x571   :  { %4241 = vmatprep.mubr.msk.f32.mxu1 %vm4585_vm1, %v4584_v6 }
 0x5ef   :  { %v4820_v28 = vpop.f32.mrf.mxu0 }
 0x5f1   :  { %v4218_v29 = vpop.f32.mrf.mxu0 }
 0x5f3   :  { %v902_v30 = vpop.f32.mrf.mxu0 }
 0x5f4   :  { %v903_v31 = vadd.f32 %v902_v30, %v4744_v19 }
 0x5f5   :  { %v4228_v32 = vpop.f32.mrf.mxu0 }
 0x5f6   :  { %v984_v33 = vsel %vm157_vm2, %v903_v31, -inf }
 0x5f7   :  { %985 = vmax.xlane.f32.xlu0 %v984_v33 }
 0x62c   :  { %v4824_v34 = vpop.f32.mrf.mxu1 }
 0x62e   :  { %v4223_v35 = vpop.f32.mrf.mxu1 }
 0x630   :  { %v980_v36 = vpop.f32.mrf.mxu1 }
 0x631   :  { %v981_v37 = vadd.f32 %v980_v36, %v4744_v19 }
 0x632   :  { %v4233_v38 = vpop.f32.mrf.mxu1 }
 0x633   :  { %v987_v39 = vsel %vm157_vm2, %v981_v37, -inf  ;;  %v1515_v38 = vld [vmem:[%s5291_s3 + $0x18] sm:$0xff] }
 0x634   :  { %988 = vmax.xlane.f32.xlu1 %v987_v39  ;;  %v1514_v39 = vld [vmem:[%s5291_s3 + $0x10] sm:$0xff] }
 0x645   :  { %1006 = vrot.lane.b32.xlu1 %v4717_v10, %s5314_s23 }
 0x649   :  { %1171 = vrot.lane.b32.xlu1 %v4717_v10, %s5312_s24 }
 0x64d   :  { %1249 = vrot.lane.b32.xlu1 %v4721_v11, %s5312_s24 }
 0x651   :  { %1247 = vrot.lane.b32.xlu1 %v4736_v15, %s5310_s25 }
 0x680   :  { %v986_v40 = vpop.xlane.xlu0 %985 }
 0x681   :  { %v990_v41 = vsub.f32 %v903_v31, %v986_v40  ;;  %v1513_v40 = vld [vmem:[%s5291_s3 + $0x8] sm:$0xff] }
 0x683   :  { %v992_v42 = vmul.f32 1.442695, %v990_v41  ;;  %v1512_v41 = vld [vmem:[%s5291_s3] sm:$0xff] }
 0x685   :  { %4482 = vpow2.f32 %v992_v42 }
 0x692   :  { %v4483_v43 = vpop.eup %4482 }
 0x693   :  { %v996_v44 = vsel %vm157_vm2, %v4483_v43, 0.0 }
 0x694   :  { %997 = vadd.xlane.f32.xlu0 %v996_v44 }
 0x6aa   :  { %1082 = vrot.lane.b32.xlu0 %v4721_v11, %s5314_s23 }
 0x6bd   :  { %v989_v45 = vpop.xlane.xlu1 %988 }
 0x6be   :  { %v991_v46 = vsub.f32 %v981_v37, %v989_v45 }
 0x6c0   :  { %v994_v47 = vmul.f32 1.442695, %v991_v46 }
 0x6c1   :  { %v1007_v48 = vpop.permute.xlu1 %1006 }
 0x6c2   :  { %4484 = vpow2.f32 %v994_v47  ;;  %4235 = vmatpush3.msra.mxu0 %v1007_v48  ;;  %v3963_v48 = vld [vmem:[%s5292_s4] ss:$0 sm:$0xff] }
 0x6c3   :  { %4244 = vmatprep.subr.mxu0 %v4584_v6 }
 0x6c5   :  { %v1172_v54 = vpop.permute.xlu1 %1171 }
 0x6c9   :  { %v1250_v57 = vpop.permute.xlu1 %1249 }
 0x6cd   :  { %v1248_v59 = vpop.permute.xlu1 %1247 }
 0x6cf   :  { %v4485_v15 = vpop.eup %4484 }
 0x6d0   :  { %v999_v49 = vsel %vm157_vm2, %v4485_v15, 0.0 }
 0x6d1   :  { %1000 = vadd.xlane.f32.xlu0 %v999_v49 }
 0x6e7   :  { %1169 = vrot.lane.b32.xlu0 %v4727_v13, %s5310_s25 }
 0x71d   :  { %v998_v50 = vpop.xlane.xlu0 %997 }
 0x71e   :  { %4486 = vrcp.f32 %v998_v50 }
 0x721   :  { %v1083_v51 = vpop.permute.xlu0 %1082 }
 0x722   :  { %4240 = vmatpush3.msra.mxu1 %v1083_v51 }
 0x723   :  { %4249 = vmatprep.subr.mxu1 %v4584_v6 }
 0x72b   :  { %v4487_v52 = vpop.eup %4486 }
 0x72c   :  { %v1004_v53 = vmul.f32 %v4487_v52, %v4483_v43 }
 0x72e   :  { %4237 = vmatmul.mubr.msk.f32.vlgmr.msra.gmra.mxu0 %vm157_vm2, %v1004_v53 }
 0x72f   :  { %4245 = vmatpush3.xpose.msk.msra.mxu0 %vm157_vm2, %v1172_v54  ;;  %4246 = vmatprep.mubr.msk.f32.mxu0 %vm4585_vm1, %v4584_v6 }
 0x730   :  { %4254 = vmatprep.subr.mxu0 %v4584_v6 }
 0x75a   :  { %v1001_v55 = vpop.xlane.xlu0 %1000 }
 0x75b   :  { %4488 = vrcp.f32 %v1001_v55 }
 0x75e   :  { %v1170_v13 = vpop.permute.xlu0 %1169 }
 0x75f   :  { %4247 = vmatmul.mubr.msk.f32.vlgmr.msra.gmra.mxu0 %vm157_vm2, %v1170_v13 }
 0x760   :  { %4256 = vmatprep.mubr.msk.f32.mxu0 %vm4585_vm1, %v4584_v6 }
 0x768   :  { %v4489_v56 = vpop.eup %4488 }
 0x769   :  { %v1005_v58 = vmul.f32 %v4489_v56, %v4485_v15 }
 0x76b   :  { %4242 = vmatmul.mubr.msk.f32.vlgmr.msra.gmra.mxu1 %vm157_vm2, %v1005_v58 }
 0x76c   :  { %4250 = vmatpush3.xpose.msk.msra.mxu1 %vm157_vm2, %v1250_v57  ;;  %4251 = vmatprep.mubr.msk.f32.mxu1 %vm4585_vm1, %v4584_v6 }
 0x76d   :  { %4259 = vmatprep.subr.mxu1 %v4584_v6 }
 0x76f   :  { %4252 = vmatmul.mubr.msk.f32.vlgmr.msra.gmra.mxu1 %vm157_vm2, %v1248_v59 }
 0x770   :  { %4261 = vmatprep.mubr.msk.f32.mxu1 %vm4585_vm1, %v4584_v6 }
 0x7ee   :  { %v1078_v60 = vpop.f32.mrf.mxu0 }
 0x7f0   :  { %v4238_v61 = vpop.f32.mrf.mxu0 }
 0x81f   :  { %v1243_v62 = vpop.f32.mrf.mxu0 }
 0x820   :  { %v1244_v63 = vadd.f32 %v1243_v62, %v4744_v19 }
 0x821   :  { %v4248_v0 = vpop.f32.mrf.mxu0 }
 0x822   :  { %v1325_v1 = vsel %vm157_vm2, %v1244_v63, -inf  ;;  %v1653_v0 = vld [vmem:[%s5293_s5 + $0x10] sm:$0xff] }
 0x823   :  { %1326 = vmax.xlane.f32.xlu0 %v1325_v1  ;;  %v1652_v1 = vld [vmem:[%s5293_s5 + $0x8] sm:$0xff] }
 0x82b   :  { %v1154_v3 = vpop.f32.mrf.mxu1 }
 0x82d   :  { %v4243_v4 = vpop.f32.mrf.mxu1 }
 0x82f   :  { %v1321_v7 = vpop.f32.mrf.mxu1 }
 0x830   :  { %v1322_v8 = vadd.f32 %v1321_v7, %v4744_v19 }
 0x831   :  { %v4253_v9 = vpop.f32.mrf.mxu1 }
 0x832   :  { %v1328_v12 = vsel %vm157_vm2, %v1322_v8, -inf }
 0x833   :  { %1329 = vmax.xlane.f32.xlu1 %v1328_v12 }
 0x844   :  { %1347 = vrot.lane.b32.xlu1 %v4717_v10, %s5308_s26 }
 0x848   :  { %819 = vrot.lane.b32.xlu1 %v4820_v28, %s5306_s27 }
 0x84c   :  { %821 = vrot.lane.b32.xlu1 %v4824_v34, %s5306_s27 }
 0x850   :  { %1162 = vrot.lane.b32.xlu1 %v1154_v3, %s5304_s28  ;;  %v1651_v3 = vld [vmem:[%s5293_s5] sm:$0xff] }
 0x8ac   :  { %v1327_v14 = vpop.xlane.xlu0 %1326 }
 0x8ad   :  { %v1331_v16 = vsub.f32 %v1244_v63, %v1327_v14 }
 0x8af   :  { %v1333_v17 = vmul.f32 1.442695, %v1331_v16 }
 0x8b1   :  { %4490 = vpow2.f32 %v1333_v17  ;;  %v3966_v17 = vld [vmem:[%s5297_s9] ss:$0 sm:$0xff] }
 0x8bc   :  { %v1330_v18 = vpop.xlane.xlu1 %1329 }
 0x8bd   :  { %v1332_v20 = vsub.f32 %v1322_v8, %v1330_v18 }
 0x8be   :  { %v4491_v21 = vpop.eup %4490 }
 0x8bf   :  { %v1335_v22 = vmul.f32 1.442695, %v1332_v20  ;;  %v1337_v10 = vsel %vm157_vm2, %v4491_v21, 0.0  ;;  %v3967_v20 = vld [vmem:[%s5298_s10] ss:$0 sm:$0xff] }
 0x8c0   :  { %1338 = vadd.xlane.f32.xlu0 %v1337_v10  ;;  %v1348_v23 = vpop.permute.xlu1 %1347 }
 0x8c1   :  { %4492 = vpow2.f32 %v1335_v22  ;;  %4255 = vmatpush3.msra.mxu0 %v1348_v23 }
 0x8c2   :  { %4264 = vmatprep.subr.mxu0 %v1515_v38 }
 0x8c4   :  { %v820_v24 = vpop.permute.xlu1 %819 }
 0x8c5   :  { %826 = vst.msk [vmem:[#allocation2] sm:$0xff] %vm825_vm4, %v820_v24 }
 0x8c8   :  { %v822_v25 = vpop.permute.xlu1 %821 }
 0x8c9   :  { %827 = vst.msk [vmem:[#allocation2 + $0x8] sm:$0xff] %vm825_vm4, %v822_v25 }
 0x8cc   :  { %v1163_v26 = vpop.permute.xlu1 %1162 }
 0x8cd   :  { %1168 = vst.msk [vmem:[#allocation2 + $0x8] sm:$0xff] %vm1166_vm5, %v1163_v26  ;;  %v1804_v26 = vld [vmem:[%s5295_s7 + $0x38] sm:$0xff] }
 0x8ce   :  { %v4493_v27 = vpop.eup %4492 }
 0x8cf   :  { %v1340_v28 = vsel %vm157_vm2, %v4493_v27, 0.0 }
 0x8d0   :  { %1341 = vadd.xlane.f32.xlu0 %v1340_v28  ;;  %v1802_v28 = vld [vmem:[%s5295_s7 + $0x28] sm:$0xff] }
 0x8e6   :  { %1423 = vrot.lane.b32.xlu0 %v4721_v11, %s5308_s26 }
 0x8ea   :  { %1160 = vrot.lane.b32.xlu0 %v1078_v60, %s5304_s28 }
 0x949   :  { %v1339_v29 = vpop.xlane.xlu0 %1338 }
 0x94a   :  { %4494 = vrcp.f32 %v1339_v29  ;;  %v1801_v29 = vld [vmem:[%s5295_s7 + $0x20] sm:$0xff] }
 0x957   :  { %v4495_v30 = vpop.eup %4494 }
 0x958   :  { %v1345_v31 = vmul.f32 %v4495_v30, %v4491_v21  ;;  %v1800_v30 = vld [vmem:[%s5295_s7 + $0x18] sm:$0xff] }
 0x959   :  { %v1342_v32 = vpop.xlane.xlu0 %1341 }
 0x95a   :  { %4496 = vrcp.f32 %v1342_v32  ;;  %4257 = vmatmul.mubr.msk.f32.vlgmr.msra.gmra.mxu0 %vm157_vm2, %v1345_v31  ;;  %v1799_v31 = vld [vmem:[%s5295_s7 + $0x10] sm:$0xff]  ;;  %v1798_v32 = vld [vmem:[%s5295_s7 + $0x8] sm:$0xff] }
 0x95b   :  { %4265 = vmatpush3.msra.mxu0 %v1515_v38 }
 0x95c   :  { %4266 = vmatprep.subr.mxu0 %v1514_v39 }
 0x95d   :  { %v1424_v33 = vpop.permute.xlu0 %1423  ;;  %4267 = vmatpush3.msra.mxu0 %v1514_v39 }
 0x95e   :  { %4260 = vmatpush3.msra.mxu1 %v1424_v33  ;;  %4268 = vmatprep.subr.mxu0 %v1513_v40  ;;  %v1797_v33 = vld [vmem:[%s5295_s7] sm:$0xff] }
 0x95f   :  { %4269 = vmatpush3.msra.mxu0 %v1513_v40 }
 0x960   :  { %4270 = vmatprep.subr.mxu0 %v1512_v41 }
 0x961   :  { %v1161_v34 = vpop.permute.xlu0 %1160  ;;  %4271 = vmatpush3.msra.mxu0 %v1512_v41 }
 0x962   :  { %1167 = vst.msk [vmem:[#allocation2] sm:$0xff] %vm1166_vm5, %v1161_v34  ;;  %4286 = vmatprep.subr.mxu0 %v1804_v26  ;;  %v3968_v34 = vld [vmem:[%s5294_s6] ss:$0 sm:$0xff] }
 0x967   :  { %v4497_v35 = vpop.eup %4496 }
 0x968   :  { %v1346_v36 = vmul.f32 %v4497_v35, %v4493_v27  ;;  %v1803_v27 = vld [vmem:[%s5295_s7 + $0x30] sm:$0xff] }
 0x96a   :  { %4262 = vmatmul.mubr.msk.f32.vlgmr.msra.gmra.mxu1 %vm157_vm2, %v1346_v36 }
 0xa1a   :  { %v1419_v11 = vpop.f32.mrf.mxu0 }
 0xa1b   :  { %1501 = vrot.lane.b32.xlu0 %v1419_v11, %s4599_s29 }
 0xa1c   :  { %v4258_v37 = vpop.f32.mrf.mxu0 }
 0xa2a   :  { %v1495_v42 = vpop.f32.mrf.mxu1 }
 0xa2b   :  { %1503 = vrot.lane.b32.xlu1 %v1495_v42, %s4599_s29 }
 0xa2c   :  { %v4263_v43 = vpop.f32.mrf.mxu1 }
 0xa8d   :  { %v1502_v44 = vpop.permute.xlu0 %1501 }
 0xa8e   :  { %1508 = vst.msk [vmem:[#allocation2] sm:$0xff] %vm1507_vm6, %v1502_v44 }
 0xa95   :  { %v1510_v45 = vld [vmem:[#allocation2] sm:$0xff] }
 0xa96   :  { %4272 = vmatprep.mubr.msk.f32.mxu0 %vm70_vm0, %v1510_v45 }
 0xa9d   :  { %v1504_v46 = vpop.permute.xlu1 %1503 }
 0xa9e   :  { %1509 = vst.msk [vmem:[#allocation2 + $0x8] sm:$0xff] %vm1507_vm6, %v1504_v46 }
 0xaa5   :  { %v1511_v47 = vld [vmem:[#allocation2 + $0x8] sm:$0xff] }
 0xaa6   :  { %4273 = vmatmul.mubr.msk.f32.vlgmr.msra.gmra.mxu0 %vm70_vm0, %v1511_v47 }
 0xaa7   :  { %4287 = vmatpush3.msra.mxu0 %v1804_v26 }
 0xaa8   :  { %4288 = vmatprep.subr.mxu0 %v1803_v27 }
 0xaa9   :  { %4289 = vmatpush3.msra.mxu0 %v1803_v27 }
 0xaaa   :  { %4290 = vmatprep.subr.mxu0 %v1802_v28 }
 0xaab   :  { %4291 = vmatpush3.msra.mxu0 %v1802_v28 }
 0xaac   :  { %4292 = vmatprep.subr.mxu0 %v1801_v29 }
 0xaad   :  { %4293 = vmatpush3.msra.mxu0 %v1801_v29  ;;  %v3971_v29 = vld [vmem:[%s5296_s8] ss:$0 sm:$0xff] }
 0xaae   :  { %4294 = vmatprep.subr.mxu0 %v1800_v30 }
 0xaaf   :  { %4295 = vmatpush3.msra.mxu0 %v1800_v30 }
 0xab0   :  { %4296 = vmatprep.subr.mxu0 %v1799_v31 }
 0xab1   :  { %4297 = vmatpush3.msra.mxu0 %v1799_v31 }
 0xab2   :  { %4298 = vmatprep.subr.mxu0 %v1798_v32 }
 0xab3   :  { %4299 = vmatpush3.msra.mxu0 %v1798_v32 }
 0xab4   :  { %4300 = vmatprep.subr.mxu0 %v1797_v33 }
 0xab5   :  { %4301 = vmatpush3.msra.mxu0 %v1797_v33 }
 0xab6   :  { %4326 = vmatprep.subr.mxu0 %v4584_v6 }
 0xb66   :  { %v4274_v15 = vpop.f32.mrf.mxu0 }
 0xb67   :  { %v1601_v49 = vadd.f32 %v4274_v15, %v3963_v48 }
 0xb68   :  { %v1595_v50 = vpop.f32.mrf.mxu0 }
 0xb69   :  { %v1596_v51 = vadd.f32 %v3963_v48, %v1595_v50  ;;  %v1605_v52 = vadd.f32 %v1601_v49, %v4704_v5 }
 0xb6b   :  { %v1611_v53 = vsel %vm70_vm0, %v1605_v52, 0.0  ;;  %v1604_v54 = vadd.f32 %v1596_v51, %v4691_v2  ;;  %v1654_v2 = vld [vmem:[%s5293_s5 + $0x18] sm:$0xff] }
 0xb6c   :  { %1612 = vadd.xlane.f32.xlu1 %v1611_v53  ;;  %4275 = vmatprep.subr.mxu1 %v1654_v2 }
 0xb6d   :  { %v1608_v55 = vsel %vm70_vm0, %v1604_v54, 0.0  ;;  %4276 = vmatpush3.msra.mxu1 %v1654_v2 }
 0xb6e   :  { %1609 = vadd.xlane.f32.xlu0 %v1608_v55  ;;  %4277 = vmatprep.subr.mxu1 %v1653_v0 }
 0xb6f   :  { %4278 = vmatpush3.msra.mxu1 %v1653_v0 }
 0xb70   :  { %4279 = vmatprep.subr.mxu1 %v1652_v1 }
 0xb71   :  { %4280 = vmatpush3.msra.mxu1 %v1652_v1 }
 0xb72   :  { %4281 = vmatprep.subr.mxu1 %v1651_v3 }
 0xb73   :  { %4282 = vmatpush3.msra.mxu1 %v1651_v3 }
 0xbf5   :  { %v1613_v13 = vpop.xlane.xlu1 %1612 }
 0xbf6   :  { %v1616_v56 = vmul.f32 0.03125, %v1613_v13 }
 0xbf7   :  { %v1610_v57 = vpop.xlane.xlu0 %1609 }
 0xbf8   :  { %v1615_v58 = vmul.f32 0.03125, %v1610_v57  ;;  %v1618_v59 = vsub.f32 %v1605_v52, %v1616_v56 }
 0xbfa   :  { %v1617_v60 = vsub.f32 %v1604_v54, %v1615_v58  ;;  %v1620_v63 = vmul.f32 %v1618_v59, %v1618_v59 }
 0xbfc   :  { %v1619_v61 = vmul.f32 %v1617_v60, %v1617_v60  ;;  %v1624_v5 = vsel %vm70_vm0, %v1620_v63, 0.0 }
 0xbfe   :  { %v1621_v62 = vsel %vm70_vm0, %v1619_v61, 0.0 }
 0xbff   :  { %1622 = vadd.xlane.f32.xlu0 %v1621_v62 }
 0xc03   :  { %1625 = vadd.xlane.f32.xlu0 %v1624_v5 }
 0xc88   :  { %v1623_v4 = vpop.xlane.xlu0 %1622 }
 0xc89   :  { %v1627_v7 = vmul.f32 0.03125, %v1623_v4 }
 0xc8b   :  { %v1629_v8 = vadd.f32 1e-05, %v1627_v7 }
 0xc8c   :  { %v1626_v9 = vpop.xlane.xlu0 %1625 }
 0xc8d   :  { %4498 = vrsqrt.f32 %v1629_v8  ;;  %v1628_v12 = vmul.f32 0.03125, %v1626_v9 }
 0xc8f   :  { %v1630_v14 = vadd.f32 1e-05, %v1628_v12 }
 0xc91   :  { %4500 = vrsqrt.f32 %v1630_v14 }
 0xc9a   :  { %v4499_v16 = vpop.eup %4498 }
 0xc9b   :  { %v1633_v18 = vmul.f32 %v4499_v16, %v1617_v60 }
 0xc9d   :  { %v1641_v21 = vmul.f32 %v3966_v17, %v1633_v18 }
 0xc9e   :  { %v4501_v22 = vpop.eup %4500 }
 0xc9f   :  { %v1634_v10 = vmul.f32 %v4501_v22, %v1618_v59  ;;  %v4927_v23 = vadd.f32 %v3967_v20, %v1641_v21 }
 0xca1   :  { %v1642_v24 = vmul.f32 %v3966_v17, %v1634_v10  ;;  %4283 = vmatprep.mubr.msk.f32.mxu1 %vm70_vm0, %v4927_v23 }
 0xca3   :  { %v4931_v25 = vadd.f32 %v3967_v20, %v1642_v24 }
 0xca5   :  { %4284 = vmatmul.mubr.msk.f32.vlgmr.msra.gmra.mxu1 %vm70_vm0, %v4931_v25 }
 0xd65   :  { %v4285_v35 = vpop.f32.mrf.mxu1 }
 0xd66   :  { %v1740_v36 = vadd.f32 %v4285_v35, %v3968_v34 }
 0xd67   :  { %v1734_v11 = vpop.f32.mrf.mxu1 }
 0xd68   :  { %v1746_v37 = vmul.f32 0.70710677, %v1740_v36  ;;  %v1735_v38 = vadd.f32 %v3968_v34, %v1734_v11  ;;  %v1744_v26 = vmul.f32 0.5, %v1740_v36 }
 0xd6a   :  { %v1748_v39 = vand.u32 2147483647, %v1746_v37  ;;  %v1745_v40 = vmul.f32 0.70710677, %v1735_v38  ;;  %vm1788_vm7 = vcmp.ge.f32.partialorder %v1746_v37, 0.0  ;;  %v1743_v10 = vmul.f32 0.5, %v1735_v38 }
 0xd6c   :  { %v1750_v41 = vmul.f32 0.3275911, %v1748_v39  ;;  %v1747_v42 = vand.u32 2147483647, %v1745_v40  ;;  %v1776_v46 = vsub.f32 0.0, %v1748_v39  ;;  %vm1787_vm8 = vcmp.ge.f32.partialorder %v1745_v40, 0.0 }
 0xd6e   :  { %v1752_v43 = vadd.f32 1.0, %v1750_v41  ;;  %v1749_v44 = vmul.f32 0.3275911, %v1747_v42  ;;  %v1775_v47 = vsub.f32 0.0, %v1747_v42  ;;  %v1778_v48 = vmul.f32 %v1776_v46, %v1748_v39  ;;  %v3978_v46 = vld [vmem:[%s5289_s1 + $0x30] sm:$0xff] }
 0xd70   :  { %4502 = vrcp.f32 %v1752_v43  ;;  %v1751_v45 = vadd.f32 1.0, %v1749_v44  ;;  %v1777_v49 = vmul.f32 %v1775_v47, %v1747_v42  ;;  %v1781_v51 = vmul.f32 1.442695, %v1778_v48  ;;  %v3977_v47 = vld [vmem:[%s5289_s1 + $0x28] sm:$0xff]  ;;  %v3976_v48 = vld [vmem:[%s5289_s1 + $0x20] sm:$0xff] }
 0xd72   :  { %4504 = vrcp.f32 %v1751_v45  ;;  %v1779_v55 = vmul.f32 1.442695, %v1777_v49 }
 0xd73   :  { %4506 = vpow2.f32 %v1781_v51 }
 0xd74   :  { %4508 = vpow2.f32 %v1779_v55  ;;  %v3974_v55 = vld [vmem:[%s5299_s11] ss:$0 sm:$0xff] }
 0xd7d   :  { %v4503_v15 = vpop.eup %4502 }
 0xd7e   :  { %v1758_v50 = vmul.f32 1.0614054, %v4503_v15 }
 0xd7f   :  { %v4505_v52 = vpop.eup %4504 }
 0xd80   :  { %v1760_v53 = vadd.f32 -1.4531521, %v1758_v50  ;;  %v1757_v54 = vmul.f32 1.0614054, %v4505_v52  ;;  %v4507_v3 = vpop.eup %4506 }
 0xd81   :  { %v4509_v9 = vpop.eup %4508 }
 0xd82   :  { %v1762_v13 = vmul.f32 %v4503_v15, %v1760_v53  ;;  %v1759_v56 = vadd.f32 -1.4531521, %v1757_v54 }
 0xd84   :  { %v1764_v57 = vadd.f32 1.4214138, %v1762_v13  ;;  %v1761_v58 = vmul.f32 %v4505_v52, %v1759_v56 }
 0xd86   :  { %v1766_v59 = vmul.f32 %v4503_v15, %v1764_v57  ;;  %v1763_v60 = vadd.f32 1.4214138, %v1761_v58 }
 0xd88   :  { %v1768_v61 = vadd.f32 -0.28449672, %v1766_v59  ;;  %v1765_v62 = vmul.f32 %v4505_v52, %v1763_v60  ;;  %v3975_v59 = vld [vmem:[%s5300_s12] ss:$0 sm:$0xff] }
 0xd8a   :  { %v1770_v63 = vmul.f32 %v4503_v15, %v1768_v61  ;;  %v1767_v5 = vadd.f32 -0.28449672, %v1765_v62 }
 0xd8c   :  { %v1772_v2 = vadd.f32 0.2548296, %v1770_v63  ;;  %v1769_v0 = vmul.f32 %v4505_v52, %v1767_v5  ;;  %v3981_v63 = vld [vmem:[%s5290_s2 + $0x1] ss:$0 sm:$0xff]  ;;  %s5316_s2 = smov 48  }
 0xd8e   :  { %v1774_v1 = vmul.f32 %v4503_v15, %v1772_v2  ;;  %v1771_v4 = vadd.f32 0.2548296, %v1769_v0 }
 0xd90   :  { %v1784_v7 = vmul.f32 %v4507_v3, %v1774_v1  ;;  %v1773_v8 = vmul.f32 %v4505_v52, %v1771_v4 }
 0xd92   :  { %v1786_v12 = vsub.f32 1.0, %v1784_v7  ;;  %v1783_v14 = vmul.f32 %v4509_v9, %v1773_v8 }
 0xd94   :  { %v1790_v16 = vsub.f32 0.0, %v1786_v12  ;;  %v1785_v17 = vsub.f32 1.0, %v1783_v14 }
 0xd96   :  { %v1792_v18 = vsel %vm1788_vm7, %v1786_v12, %v1790_v16  ;;  %v1789_v20 = vsub.f32 0.0, %v1785_v17 }
 0xd97   :  { %v1794_v21 = vadd.f32 1.0, %v1792_v18 }
 0xd98   :  { %v1791_v22 = vsel %vm1787_vm8, %v1785_v17, %v1789_v20 }
 0xd99   :  { %v1793_v24 = vadd.f32 1.0, %v1791_v22  ;;  %v1796_v28 = vmul.f32 %v1794_v21, %v1744_v26 }
 0xd9b   :  { %v1795_v27 = vmul.f32 %v1793_v24, %v1743_v10 }
 0xd9d   :  { %4302 = vmatprep.mubr.msk.f32.mxu0 %vm1812_vm9, %v1795_v27 }
 0xd9e   :  { %4303 = vmatmul.mubr.msk.f32.vlgmr.msra.gmra.mxu0 %vm1812_vm9, %v1796_v28 }
 0xd9f   :  { %4328 = vmatprep.mubr.msk.f32.mxu0 %vm4585_vm1, %v4584_v6 }
 0xe5e   :  { %v4304_v30 = vpop.f32.mrf.mxu0 }
 0xe5f   :  { %v1891_v31 = vadd.f32 %v4304_v30, %v3971_v29 }
 0xe60   :  { %v1885_v32 = vpop.f32.mrf.mxu0 }
 0xe61   :  { %v1886_v33 = vadd.f32 %v3971_v29, %v1885_v32  ;;  %v1895_v34 = vadd.f32 %v1891_v31, %v4931_v25 }
 0xe63   :  { %v1901_v35 = vsel %vm70_vm0, %v1895_v34, 0.0  ;;  %v1894_v36 = vadd.f32 %v1886_v33, %v4927_v23  ;;  %v3979_v23 = vld [vmem:[%s5289_s1 + $0x38] sm:$0xff] }
 0xe64   :  { %1902 = vadd.xlane.f32.xlu0 %v1901_v35  ;;  %4305 = vmatprep.subr.mxu1 %v3979_v23 }
 0xe65   :  { %v1898_v11 = vsel %vm70_vm0, %v1894_v36, 0.0  ;;  %4306 = vmatpush3.msra.mxu1 %v3979_v23 }
 0xe66   :  { %1899 = vadd.xlane.f32.xlu1 %v1898_v11  ;;  %4307 = vmatprep.subr.mxu1 %v3978_v46 }
 0xe67   :  { %4308 = vmatpush3.msra.mxu1 %v3978_v46 }
 0xe68   :  { %4309 = vmatprep.subr.mxu1 %v3977_v47 }
 0xe69   :  { %4310 = vmatpush3.msra.mxu1 %v3977_v47 }
 0xe6a   :  { %4311 = vmatprep.subr.mxu1 %v3976_v48 }
 0xe6b   :  { %4312 = vmatpush3.msra.mxu1 %v3976_v48 }
 0xe6c   :  { %4316 = vmatprep.subr.mxu1 %v4584_v6 }
 0xeed   :  { %v1903_v37 = vpop.xlane.xlu0 %1902 }
 0xeee   :  { %v1905_v38 = vmul.f32 0.03125, %v1903_v37 }
 0xeef   :  { %v1900_v39 = vpop.xlane.xlu1 %1899 }
 0xef0   :  { %v1907_v40 = vsub.f32 %v1895_v34, %v1905_v38  ;;  %v1904_v41 = vmul.f32 0.03125, %v1900_v39 }
 0xef2   :  { %v1906_v42 = vsub.f32 %v1894_v36, %v1904_v41  ;;  %v1909_v43 = vmul.f32 %v1907_v40, %v1907_v40 }
 0xef4   :  { %v1913_v44 = vsel %vm70_vm0, %v1909_v43, 0.0  ;;  %v1908_v45 = vmul.f32 %v1906_v42, %v1906_v42 }
 0xef5   :  { %1914 = vadd.xlane.f32.xlu0 %v1913_v44 }
 0xef6   :  { %v1910_v25 = vsel %vm70_vm0, %v1908_v45, 0.0 }
 0xef7   :  { %1911 = vadd.xlane.f32.xlu1 %v1910_v25 }
 0xf7e   :  { %v1915_v15 = vpop.xlane.xlu0 %1914 }
 0xf7f   :  { %v1917_v49 = vmul.f32 0.03125, %v1915_v15 }
 0xf80   :  { %v1912_v50 = vpop.xlane.xlu1 %1911 }
 0xf81   :  { %v1919_v51 = vadd.f32 1e-05, %v1917_v49  ;;  %v1916_v52 = vmul.f32 0.03125, %v1912_v50 }
 0xf83   :  { %4510 = vrsqrt.f32 %v1919_v51  ;;  %v1918_v53 = vadd.f32 1e-05, %v1916_v52 }
 0xf85   :  { %4512 = vrsqrt.f32 %v1918_v53 }
 0xf90   :  { %v4511_v54 = vpop.eup %4510 }
 0xf91   :  { %v1923_v13 = vmul.f32 %v4511_v54, %v1907_v40 }
 0xf92   :  { %v4513_v56 = vpop.eup %4512 }
 0xf93   :  { %v1922_v57 = vmul.f32 %v4513_v56, %v1906_v42  ;;  %v1931_v58 = vmul.f32 %v3974_v55, %v1923_v13 }
 0xf95   :  { %v1930_v60 = vmul.f32 %v3974_v55, %v1922_v57  ;;  %v4997_v62 = vadd.f32 %v3975_v59, %v1931_v58 }
 0xf97   :  { %v4995_v61 = vadd.f32 %v3975_v59, %v1930_v60 }
 0xf99   :  { %4313 = vmatprep.mubr.msk.f32.mxu1 %vm70_vm0, %v4995_v61 }
 0xf9a   :  { %4314 = vmatmul.mubr.msk.f32.vlgmr.msra.gmra.mxu1 %vm70_vm0, %v4997_v62 }
 0xf9b   :  { %4318 = vmatprep.mubr.msk.f32.mxu1 %vm4585_vm1, %v4584_v6 }
0x105a   :  { %v4315_v5 = vpop.f32.mrf.mxu1 }
0x105b   :  { %v5008_v2 = vadd.f32 %v4315_v5, %v3981_v63 }
0x105c   :  { %v2025_v0 = vpop.f32.mrf.mxu1 }
0x105d   :  { %v5010_v1 = vadd.f32 %v3981_v63, %v2025_v0  ;;  %2115 = vrot.lane.b32.xlu0 %v5008_v2, %s4586_s16  ;;  %v5027_v8 = vmul.f32 0.35355338, %v5008_v2 }
0x105f   :  { %2037 = vrot.lane.b32.xlu1 %v5010_v1, %s4586_s16  ;;  %v5018_v4 = vmul.f32 0.35355338, %v5010_v1  ;;  %s5317_s16 = smov 72  }
0x10cf   :  { %v2116_v7 = vpop.permute.xlu0 %2115 }
0x10d1   :  { %v2038_v3 = vpop.permute.xlu1 %2037 }
0x10d2   :  { %4317 = vmatpush3.xpose.msk.msra.mxu1 %vm157_vm2, %v2038_v3 }
0x10d3   :  { %4321 = vmatprep.subr.mxu1 %v4584_v6 }
0x10d5   :  { %4319 = vmatmul.mubr.msk.f32.vlgmr.msra.gmra.mxu1 %vm157_vm2, %v5018_v4 }
0x10d6   :  { %4322 = vmatpush3.xpose.msk.msra.mxu1 %vm157_vm2, %v2116_v7  ;;  %4323 = vmatprep.mubr.msk.f32.mxu1 %vm4585_vm1, %v4584_v6 }
0x10d7   :  { %4331 = vmatprep.subr.mxu1 %v4584_v6 }
0x10d9   :  { %4324 = vmatmul.mubr.msk.f32.vlgmr.msra.gmra.mxu1 %vm157_vm2, %v5027_v8 }
0x10da   :  { %4333 = vmatprep.mubr.msk.f32.mxu1 %vm4585_vm1, %v4584_v6 }
0x1195   :  { %v2110_v9 = vpop.f32.mrf.mxu1 }
0x1196   :  { %v2111_v12 = vadd.f32 %v2110_v9, %v4744_v19 }
0x1197   :  { %v4320_v14 = vpop.f32.mrf.mxu1 }
0x1198   :  { %v2192_v16 = vsel %vm157_vm2, %v2111_v12, -inf }
0x1199   :  { %2193 = vmax.xlane.f32.xlu1 %v2192_v16  ;;  %v2188_v17 = vpop.f32.mrf.mxu1 }
0x119a   :  { %v2189_v18 = vadd.f32 %v2188_v17, %v4744_v19 }
0x119b   :  { %v4325_v20 = vpop.f32.mrf.mxu1 }
0x119c   :  { %v2195_v21 = vsel %vm157_vm2, %v2189_v18, -inf }
0x119d   :  { %2196 = vmax.xlane.f32.xlu0 %v2195_v21 }
0x11aa   :  { %2214 = vrot.lane.b32.xlu1 %v5010_v1, %s4587_s17 }
0x11ae   :  { %2370 = vrot.lane.b32.xlu1 %v5010_v1, %s4588_s18 }
0x11b2   :  { %2448 = vrot.lane.b32.xlu1 %v5008_v2, %s4588_s18  ;;  %s5319_s18 = smov 40  }
0x11b3   :  { %2290 = vrot.lane.b32.xlu0 %v5008_v2, %s4587_s17  ;;  %s5318_s17 = smov 104  }
0x1222   :  { %v2194_v22 = vpop.xlane.xlu1 %2193 }
0x1223   :  { %v2198_v10 = vsub.f32 %v2111_v12, %v2194_v22 }
0x1225   :  { %v2200_v24 = vmul.f32 1.442695, %v2198_v10 }
0x1226   :  { %v2215_v26 = vpop.permute.xlu1 %2214  ;;  %v2197_v27 = vpop.xlane.xlu0 %2196 }
0x1227   :  { %4514 = vpow2.f32 %v2200_v24  ;;  %v2199_v28 = vsub.f32 %v2189_v18, %v2197_v27  ;;  %4327 = vmatpush3.msra.mxu0 %v2215_v26 }
0x1228   :  { %4336 = vmatprep.subr.mxu0 %v4584_v6 }
0x1229   :  { %v2202_v29 = vmul.f32 1.442695, %v2199_v28 }
0x122a   :  { %v2291_v30 = vpop.permute.xlu0 %2290  ;;  %v2371_v35 = vpop.permute.xlu1 %2370 }
0x122b   :  { %4516 = vpow2.f32 %v2202_v29  ;;  %4332 = vmatpush3.msra.mxu1 %v2291_v30 }
0x122c   :  { %4341 = vmatprep.subr.mxu1 %v4584_v6 }
0x122e   :  { %v2449_v36 = vpop.permute.xlu1 %2448 }
0x1234   :  { %v4515_v31 = vpop.eup %4514 }
0x1235   :  { %v2204_v32 = vsel %vm157_vm2, %v4515_v31, 0.0 }
0x1236   :  { %2205 = vadd.xlane.f32.xlu1 %v2204_v32 }
0x1238   :  { %v4517_v33 = vpop.eup %4516 }
0x1239   :  { %v2207_v34 = vsel %vm157_vm2, %v4517_v33, 0.0 }
0x123a   :  { %2208 = vadd.xlane.f32.xlu0 %v2207_v34 }
0x1247   :  { %2446 = vrot.lane.b32.xlu1 %v5027_v8, %s4589_s19 }
0x1250   :  { %2368 = vrot.lane.b32.xlu0 %v5018_v4, %s4589_s19  ;;  %s5320_s19 = smov 8  }
0x12bf   :  { %v2206_v11 = vpop.xlane.xlu1 %2205 }
0x12c0   :  { %4518 = vrcp.f32 %v2206_v11 }
0x12c3   :  { %v2209_v37 = vpop.xlane.xlu0 %2208  ;;  %v2447_v43 = vpop.permute.xlu1 %2446 }
0x12c4   :  { %4520 = vrcp.f32 %v2209_v37 }
0x12c7   :  { %v2369_v42 = vpop.permute.xlu0 %2368 }
0x12cd   :  { %v4519_v38 = vpop.eup %4518 }
0x12ce   :  { %v2212_v39 = vmul.f32 %v4519_v38, %v4515_v31 }
0x12d0   :  { %4329 = vmatmul.mubr.msk.f32.vlgmr.msra.gmra.mxu0 %vm157_vm2, %v2212_v39 }
0x12d1   :  { %v4521_v40 = vpop.eup %4520  ;;  %4337 = vmatpush3.xpose.msk.msra.mxu0 %vm157_vm2, %v2371_v35  ;;  %4338 = vmatprep.mubr.msk.f32.mxu0 %vm4585_vm1, %v4584_v6 }
0x12d2   :  { %v2213_v41 = vmul.f32 %v4521_v40, %v4517_v33  ;;  %4346 = vmatprep.subr.mxu0 %v4584_v6 }
0x12d4   :  { %4334 = vmatmul.mubr.msk.f32.vlgmr.msra.gmra.mxu1 %vm157_vm2, %v2213_v41  ;;  %4339 = vmatmul.mubr.msk.f32.vlgmr.msra.gmra.mxu0 %vm157_vm2, %v2369_v42 }
0x12d5   :  { %4342 = vmatpush3.xpose.msk.msra.mxu1 %vm157_vm2, %v2449_v36  ;;  %4343 = vmatprep.mubr.msk.f32.mxu1 %vm4585_vm1, %v4584_v6 }
0x12d6   :  { %4351 = vmatprep.subr.mxu1 %v4584_v6  ;;  %4348 = vmatprep.mubr.msk.f32.mxu0 %vm4585_vm1, %v4584_v6 }
0x12d8   :  { %4344 = vmatmul.mubr.msk.f32.vlgmr.msra.gmra.mxu1 %vm157_vm2, %v2447_v43 }
0x12d9   :  { %4353 = vmatprep.mubr.msk.f32.mxu1 %vm4585_vm1, %v4584_v6 }
0x1390   :  { %v2286_v44 = vpop.f32.mrf.mxu0 }
0x1391   :  { %2366 = vst.msk [vmem:[#allocation2] sm:$0xff] %vm157_vm2, %v2286_v44 }
0x1392   :  { %v4330_v45 = vpop.f32.mrf.mxu0 }
0x1394   :  { %v2362_v25 = vpop.f32.mrf.mxu1  ;;  %v2442_v23 = vpop.f32.mrf.mxu0 }
0x1395   :  { %2367 = vst.msk [vmem:[#allocation2 + $0x8] sm:$0xff] %vm157_vm2, %v2362_v25  ;;  %v2443_v46 = vadd.f32 %v2442_v23, %v4744_v19 }
0x1396   :  { %v4335_v47 = vpop.f32.mrf.mxu1  ;;  %v4340_v48 = vpop.f32.mrf.mxu0 }
0x1397   :  { %v2524_v15 = vsel %vm157_vm2, %v2443_v46, -inf }
0x1398   :  { %2525 = vmax.xlane.f32.xlu0 %v2524_v15  ;;  %v2520_v49 = vpop.f32.mrf.mxu1 }
0x1399   :  { %v2521_v50 = vadd.f32 %v2520_v49, %v4744_v19 }
0x139a   :  { %v4345_v51 = vpop.f32.mrf.mxu1 }
0x139b   :  { %v2527_v52 = vsel %vm157_vm2, %v2521_v50, -inf }
0x139c   :  { %2528 = vmax.xlane.f32.xlu1 %v2527_v52 }
0x13ad   :  { %2546 = vrot.lane.b32.xlu1 %v5010_v1, %s4590_s20 }
0x13ae   :  { %2622 = vrot.lane.b32.xlu0 %v5008_v2, %s4590_s20  ;;  %s5321_s20 = smov 16  }
0x13b1   :  { %2710 = vrot.lane.b32.xlu1 %v5010_v1, %s4592_s22 }
0x13b5   :  { %2788 = vrot.lane.b32.xlu1 %v5008_v2, %s4592_s22 }
0x13b9   :  { %2786 = vrot.lane.b32.xlu1 %v5027_v8, %s4591_s21 }
0x1421   :  { %v2526_v53 = vpop.xlane.xlu0 %2525 }
0x1422   :  { %v2530_v54 = vsub.f32 %v2443_v46, %v2526_v53 }
0x1424   :  { %v2532_v55 = vmul.f32 1.442695, %v2530_v54 }
0x1425   :  { %v2623_v13 = vpop.permute.xlu0 %2622  ;;  %v2529_v56 = vpop.xlane.xlu1 %2528 }
0x1426   :  { %4522 = vpow2.f32 %v2532_v55  ;;  %v2531_v57 = vsub.f32 %v2521_v50, %v2529_v56  ;;  %4352 = vmatpush3.msra.mxu1 %v2623_v13 }
0x1427   :  { %4361 = vmatprep.subr.mxu1 %v4584_v6 }
0x1428   :  { %v2534_v58 = vmul.f32 1.442695, %v2531_v57 }
0x1429   :  { %v2547_v59 = vpop.permute.xlu1 %2546 }
0x142a   :  { %4524 = vpow2.f32 %v2534_v58  ;;  %4347 = vmatpush3.msra.mxu0 %v2547_v59 }
0x142b   :  { %4356 = vmatprep.subr.mxu0 %v4584_v6 }
0x142d   :  { %v2711_v9 = vpop.permute.xlu1 %2710 }
0x1431   :  { %v2789_v17 = vpop.permute.xlu1 %2788 }
0x1433   :  { %v4523_v60 = vpop.eup %4522 }
0x1434   :  { %v2536_v63 = vsel %vm157_vm2, %v4523_v60, 0.0 }
0x1435   :  { %2537 = vadd.xlane.f32.xlu0 %v2536_v63  ;;  %v2787_v21 = vpop.permute.xlu1 %2786 }
0x1437   :  { %v4525_v5 = vpop.eup %4524 }
0x1438   :  { %v2539_v0 = vsel %vm157_vm2, %v4525_v5, 0.0 }
0x1439   :  { %2540 = vadd.xlane.f32.xlu0 %v2539_v0 }
0x144f   :  { %2708 = vrot.lane.b32.xlu0 %v5018_v4, %s4591_s21 }
0x14be   :  { %v2538_v3 = vpop.xlane.xlu0 %2537 }
0x14bf   :  { %4526 = vrcp.f32 %v2538_v3 }
0x14c2   :  { %v2541_v7 = vpop.xlane.xlu0 %2540 }
0x14c3   :  { %4528 = vrcp.f32 %v2541_v7 }
0x14c6   :  { %v2709_v20 = vpop.permute.xlu0 %2708 }
0x14cc   :  { %v4527_v12 = vpop.eup %4526 }
0x14cd   :  { %v2544_v14 = vmul.f32 %v4527_v12, %v4523_v60 }
0x14cf   :  { %4349 = vmatmul.mubr.msk.f32.vlgmr.msra.gmra.mxu0 %vm157_vm2, %v2544_v14 }
0x14d0   :  { %v4529_v16 = vpop.eup %4528  ;;  %4357 = vmatpush3.xpose.msk.msra.mxu0 %vm157_vm2, %v2711_v9  ;;  %4358 = vmatprep.mubr.msk.f32.mxu0 %vm4585_vm1, %v4584_v6 }
0x14d1   :  { %v2545_v18 = vmul.f32 %v4529_v16, %v4525_v5  ;;  %4366 = vmatprep.subr.mxu0 %v4584_v6 }
0x14d3   :  { %4354 = vmatmul.mubr.msk.f32.vlgmr.msra.gmra.mxu1 %vm157_vm2, %v2545_v18  ;;  %4359 = vmatmul.mubr.msk.f32.vlgmr.msra.gmra.mxu0 %vm157_vm2, %v2709_v20 }
0x14d4   :  { %4362 = vmatpush3.xpose.msk.msra.mxu1 %vm157_vm2, %v2789_v17  ;;  %4363 = vmatprep.mubr.msk.f32.mxu1 %vm4585_vm1, %v4584_v6 }
0x14d5   :  { %4371 = vmatprep.subr.mxu1 %v4584_v6  ;;  %4368 = vmatprep.mubr.msk.f32.mxu0 %vm4585_vm1, %v4584_v6 }
0x14d7   :  { %4364 = vmatmul.mubr.msk.f32.vlgmr.msra.gmra.mxu1 %vm157_vm2, %v2787_v21 }
0x14d8   :  { %4373 = vmatprep.mubr.msk.f32.mxu1 %vm4585_vm1, %v4584_v6 }
0x158f   :  { %v5108_v22 = vpop.f32.mrf.mxu0 }
0x1591   :  { %v4350_v10 = vpop.f32.mrf.mxu0 }
0x1593   :  { %v5110_v24 = vpop.f32.mrf.mxu1  ;;  %v2782_v26 = vpop.f32.mrf.mxu0 }
0x1594   :  { %v2783_v27 = vadd.f32 %v2782_v26, %v4744_v19 }
0x1595   :  { %v4355_v28 = vpop.f32.mrf.mxu1  ;;  %v4360_v29 = vpop.f32.mrf.mxu0 }
0x1596   :  { %v2864_v30 = vsel %vm157_vm2, %v2783_v27, -inf }
0x1597   :  { %2865 = vmax.xlane.f32.xlu0 %v2864_v30  ;;  %v2860_v31 = vpop.f32.mrf.mxu1  ;;  %v4010_v30 = vld [vmem:[%s5291_s3 + $0x30] sm:$0xff] }
0x1598   :  { %v2861_v32 = vadd.f32 %v2860_v31, %v4744_v19  ;;  %v4009_v31 = vld [vmem:[%s5291_s3 + $0x28] sm:$0xff] }
0x1599   :  { %v4365_v33 = vpop.f32.mrf.mxu1 }
0x159a   :  { %v2867_v34 = vsel %vm157_vm2, %v2861_v32, -inf }
0x159b   :  { %2868 = vmax.xlane.f32.xlu1 %v2867_v34 }
0x15ac   :  { %2886 = vrot.lane.b32.xlu1 %v5010_v1, %s5316_s2 }
0x15ad   :  { %2962 = vrot.lane.b32.xlu0 %v5008_v2, %s5316_s2 }
0x15b0   :  { %3050 = vrot.lane.b32.xlu1 %v5010_v1, %s5317_s16 }
0x15b4   :  { %3128 = vrot.lane.b32.xlu1 %v5008_v2, %s5317_s16 }
0x15b8   :  { %3126 = vrot.lane.b32.xlu1 %v5027_v8, %s5318_s17 }
0x1620   :  { %v2866_v35 = vpop.xlane.xlu0 %2865 }
0x1621   :  { %v2870_v36 = vsub.f32 %v2783_v27, %v2866_v35 }
0x1623   :  { %v2872_v11 = vmul.f32 1.442695, %v2870_v36 }
0x1624   :  { %v2963_v37 = vpop.permute.xlu0 %2962  ;;  %v2869_v38 = vpop.xlane.xlu1 %2868 }
0x1625   :  { %4530 = vpow2.f32 %v2872_v11  ;;  %v2871_v39 = vsub.f32 %v2861_v32, %v2869_v38  ;;  %4372 = vmatpush3.msra.mxu1 %v2963_v37  ;;  %v4008_v32 = vld [vmem:[%s5291_s3 + $0x20] sm:$0xff] }
0x1626   :  { %4381 = vmatprep.subr.mxu1 %v4584_v6 }
0x1627   :  { %v2874_v40 = vmul.f32 1.442695, %v2871_v39 }
0x1628   :  { %v2887_v41 = vpop.permute.xlu1 %2886 }
0x1629   :  { %4532 = vpow2.f32 %v2874_v40  ;;  %4367 = vmatpush3.msra.mxu0 %v2887_v41  ;;  %v4013_v40 = vld [vmem:[%s5292_s4 + $0x1] ss:$0 sm:$0xff] }
0x162a   :  { %4376 = vmatprep.subr.mxu0 %v4584_v6 }
0x162c   :  { %v3051_v23 = vpop.permute.xlu1 %3050 }
0x1630   :  { %v3129_v15 = vpop.permute.xlu1 %3128 }
0x1632   :  { %v4531_v42 = vpop.eup %4530 }
0x1633   :  { %v2876_v43 = vsel %vm157_vm2, %v4531_v42, 0.0 }
0x1634   :  { %2877 = vadd.xlane.f32.xlu0 %v2876_v43  ;;  %v3127_v50 = vpop.permute.xlu1 %3126 }
0x1636   :  { %v4533_v8 = vpop.eup %4532 }
0x1637   :  { %v2879_v44 = vsel %vm157_vm2, %v4533_v8, 0.0 }
0x1638   :  { %2880 = vadd.xlane.f32.xlu0 %v2879_v44 }
0x164e   :  { %3048 = vrot.lane.b32.xlu0 %v5018_v4, %s5318_s17 }
0x16bd   :  { %v2878_v45 = vpop.xlane.xlu0 %2877 }
0x16be   :  { %4534 = vrcp.f32 %v2878_v45 }
0x16c1   :  { %v2881_v25 = vpop.xlane.xlu0 %2880 }
0x16c2   :  { %4536 = vrcp.f32 %v2881_v25 }
0x16c5   :  { %v3049_v4 = vpop.permute.xlu0 %3048 }
0x16cb   :  { %v4535_v46 = vpop.eup %4534 }
0x16cc   :  { %v2884_v47 = vmul.f32 %v4535_v46, %v4531_v42 }
0x16ce   :  { %4369 = vmatmul.mubr.msk.f32.vlgmr.msra.gmra.mxu0 %vm157_vm2, %v2884_v47 }
0x16cf   :  { %v4537_v48 = vpop.eup %4536  ;;  %4377 = vmatpush3.xpose.msk.msra.mxu0 %vm157_vm2, %v3051_v23  ;;  %4378 = vmatprep.mubr.msk.f32.mxu0 %vm4585_vm1, %v4584_v6 }
0x16d0   :  { %v2885_v49 = vmul.f32 %v4537_v48, %v4533_v8  ;;  %4386 = vmatprep.subr.mxu0 %v4584_v6 }
0x16d2   :  { %4374 = vmatmul.mubr.msk.f32.vlgmr.msra.gmra.mxu1 %vm157_vm2, %v2885_v49  ;;  %4379 = vmatmul.mubr.msk.f32.vlgmr.msra.gmra.mxu0 %vm157_vm2, %v3049_v4 }
0x16d3   :  { %4382 = vmatpush3.xpose.msk.msra.mxu1 %vm157_vm2, %v3129_v15  ;;  %4383 = vmatprep.mubr.msk.f32.mxu1 %vm4585_vm1, %v4584_v6 }
0x16d4   :  { %4391 = vmatprep.subr.mxu1 %v4584_v6  ;;  %4388 = vmatprep.mubr.msk.f32.mxu0 %vm4585_vm1, %v4584_v6 }
0x16d6   :  { %4384 = vmatmul.mubr.msk.f32.vlgmr.msra.gmra.mxu1 %vm157_vm2, %v3127_v50 }
0x16d7   :  { %4393 = vmatprep.mubr.msk.f32.mxu1 %vm4585_vm1, %v4584_v6 }
0x178e   :  { %v2958_v51 = vpop.f32.mrf.mxu0 }
0x1790   :  { %v4370_v52 = vpop.f32.mrf.mxu0 }
0x1792   :  { %v3034_v53 = vpop.f32.mrf.mxu1  ;;  %v3122_v54 = vpop.f32.mrf.mxu0 }
0x1793   :  { %v3123_v55 = vadd.f32 %v3122_v54, %v4744_v19  ;;  %v4021_v54 = vld [vmem:[%s5293_s5 + $0x28] sm:$0xff] }
0x1794   :  { %v4375_v13 = vpop.f32.mrf.mxu1  ;;  %v4380_v56 = vpop.f32.mrf.mxu0 }
0x1795   :  { %v3204_v57 = vsel %vm157_vm2, %v3123_v55, -inf }
0x1796   :  { %3205 = vmax.xlane.f32.xlu0 %v3204_v57  ;;  %v3200_v58 = vpop.f32.mrf.mxu1 }
0x1797   :  { %v3201_v59 = vadd.f32 %v3200_v58, %v4744_v19 }
0x1798   :  { %v4385_v60 = vpop.f32.mrf.mxu1 }
0x1799   :  { %v3207_v63 = vsel %vm157_vm2, %v3201_v59, -inf }
0x179a   :  { %3208 = vmax.xlane.f32.xlu1 %v3207_v63 }
0x17ab   :  { %3226 = vrot.lane.b32.xlu1 %v5010_v1, %s5319_s18 }
0x17af   :  { %2700 = vrot.lane.b32.xlu1 %v5108_v22, %s5320_s19 }
0x17b3   :  { %2702 = vrot.lane.b32.xlu1 %v5110_v24, %s5320_s19 }
0x17b7   :  { %3042 = vrot.lane.b32.xlu1 %v3034_v53, %s5321_s20  ;;  %v4022_v53 = vld [vmem:[%s5293_s5 + $0x30] sm:$0xff] }
0x181f   :  { %v3206_v6 = vpop.xlane.xlu0 %3205 }
0x1820   :  { %v3210_v5 = vsub.f32 %v3123_v55, %v3206_v6  ;;  %v4020_v55 = vld [vmem:[%s5293_s5 + $0x20] sm:$0xff] }
0x1821   :  { %v4018_v6 = vld [vmem:[%s5297_s9 + $0x1] ss:$0 sm:$0xff] }
0x1822   :  { %v3212_v0 = vmul.f32 1.442695, %v3210_v5 }
0x1823   :  { %v3209_v3 = vpop.xlane.xlu1 %3208 }
0x1824   :  { %4538 = vpow2.f32 %v3212_v0  ;;  %v3211_v19 = vsub.f32 %v3201_v59, %v3209_v3  ;;  %v4019_v0 = vld [vmem:[%s5298_s10 + $0x1] ss:$0 sm:$0xff] }
0x1826   :  { %v3214_v7 = vmul.f32 1.442695, %v3211_v19 }
0x1827   :  { %v3227_v9 = vpop.permute.xlu1 %3226 }
0x1828   :  { %4540 = vpow2.f32 %v3214_v7  ;;  %4387 = vmatpush3.msra.mxu0 %v3227_v9 }
0x182b   :  { %v2701_v12 = vpop.permute.xlu1 %2700 }
0x182c   :  { %2706 = vst.msk [vmem:[#allocation2] sm:$0xff] %vm825_vm4, %v2701_v12 }
0x182f   :  { %v2703_v1 = vpop.permute.xlu1 %2702 }
0x1830   :  { %2707 = vst.msk [vmem:[#allocation2 + $0x8] sm:$0xff] %vm825_vm4, %v2703_v1 }
0x1831   :  { %v4539_v14 = vpop.eup %4538 }
0x1832   :  { %v3216_v16 = vsel %vm157_vm2, %v4539_v14, 0.0 }
0x1833   :  { %3217 = vadd.xlane.f32.xlu0 %v3216_v16  ;;  %v3043_v17 = vpop.permute.xlu1 %3042  ;;  %v4034_v16 = vld [vmem:[%s5295_s7 + $0x70] sm:$0xff] }
0x1834   :  { %3047 = vst.msk [vmem:[#allocation2 + $0x8] sm:$0xff] %vm1166_vm5, %v3043_v17  ;;  %v4033_v17 = vld [vmem:[%s5295_s7 + $0x68] sm:$0xff] }
0x1835   :  { %v4541_v18 = vpop.eup %4540 }
0x1836   :  { %v3219_v20 = vsel %vm157_vm2, %v4541_v18, 0.0 }
0x1837   :  { %3220 = vadd.xlane.f32.xlu0 %v3219_v20  ;;  %v4031_v20 = vld [vmem:[%s5295_s7 + $0x58] sm:$0xff] }
0x184d   :  { %3302 = vrot.lane.b32.xlu0 %v5008_v2, %s5319_s18  ;;  %v4011_v2 = vld [vmem:[%s5291_s3 + $0x38] sm:$0xff] }
0x184e   :  { %4396 = vmatprep.subr.mxu0 %v4011_v2 }
0x1851   :  { %3040 = vrot.lane.b32.xlu0 %v2958_v51, %s5321_s20 }
0x18bc   :  { %v3218_v21 = vpop.xlane.xlu0 %3217 }
0x18bd   :  { %4542 = vrcp.f32 %v3218_v21  ;;  %v4030_v21 = vld [vmem:[%s5295_s7 + $0x50] sm:$0xff] }
0x18c0   :  { %v3221_v22 = vpop.xlane.xlu0 %3220 }
0x18c1   :  { %4544 = vrcp.f32 %v3221_v22  ;;  %v4029_v22 = vld [vmem:[%s5295_s7 + $0x48] sm:$0xff] }
0x18c4   :  { %v3303_v10 = vpop.permute.xlu0 %3302 }
0x18c5   :  { %4392 = vmatpush3.msra.mxu1 %v3303_v10  ;;  %v4028_v10 = vld [vmem:[%s5295_s7 + $0x40] sm:$0xff] }
0x18c8   :  { %v3041_v24 = vpop.permute.xlu0 %3040 }
0x18c9   :  { %3046 = vst.msk [vmem:[#allocation2] sm:$0xff] %vm1166_vm5, %v3041_v24  ;;  %v4025_v24 = vld [vmem:[%s5294_s6 + $0x1] ss:$0 sm:$0xff] }
0x18ca   :  { %v4543_v26 = vpop.eup %4542 }
0x18cb   :  { %v3224_v27 = vmul.f32 %v4543_v26, %v4539_v14  ;;  %v4035_v14 = vld [vmem:[%s5295_s7 + $0x78] sm:$0xff] }
0x18cd   :  { %4389 = vmatmul.mubr.msk.f32.vlgmr.msra.gmra.mxu0 %vm157_vm2, %v3224_v27 }
0x18ce   :  { %v4545_v28 = vpop.eup %4544  ;;  %4397 = vmatpush3.msra.mxu0 %v4011_v2 }
0x18cf   :  { %v3225_v29 = vmul.f32 %v4545_v28, %v4541_v18  ;;  %4398 = vmatprep.subr.mxu0 %v4010_v30  ;;  %v4032_v18 = vld [vmem:[%s5295_s7 + $0x60] sm:$0xff] }
0x18d0   :  { %4399 = vmatpush3.msra.mxu0 %v4010_v30 }
0x18d1   :  { %4394 = vmatmul.mubr.msk.f32.vlgmr.msra.gmra.mxu1 %vm157_vm2, %v3225_v29  ;;  %4400 = vmatprep.subr.mxu0 %v4009_v31 }
0x18d2   :  { %4401 = vmatpush3.msra.mxu0 %v4009_v31 }
0x18d3   :  { %4402 = vmatprep.subr.mxu0 %v4008_v32 }
0x18d4   :  { %4403 = vmatpush3.msra.mxu0 %v4008_v32 }
0x18d5   :  { %4418 = vmatprep.subr.mxu0 %v4035_v14 }
0x198d   :  { %v3298_v33 = vpop.f32.mrf.mxu0 }
0x198e   :  { %3380 = vrot.lane.b32.xlu0 %v3298_v33, %s4599_s29 }
0x198f   :  { %v4390_v34 = vpop.f32.mrf.mxu0 }
0x1991   :  { %v3374_v35 = vpop.f32.mrf.mxu1 }
0x1992   :  { %3382 = vrot.lane.b32.xlu1 %v3374_v35, %s4599_s29 }
0x1993   :  { %v4395_v36 = vpop.f32.mrf.mxu1 }
0x1a00   :  { %v3381_v11 = vpop.permute.xlu0 %3380 }
0x1a01   :  { %3386 = vst.msk [vmem:[#allocation2] sm:$0xff] %vm1507_vm6, %v3381_v11 }
0x1a04   :  { %v3383_v37 = vpop.permute.xlu1 %3382 }
0x1a05   :  { %3387 = vst.msk [vmem:[#allocation2 + $0x8] sm:$0xff] %vm1507_vm6, %v3383_v37 }
0x1a08   :  { %v3388_v38 = vld [vmem:[#allocation2] sm:$0xff] }
0x1a09   :  { %4404 = vmatprep.mubr.msk.f32.mxu0 %vm70_vm0, %v3388_v38 }
0x1a0c   :  { %v3389_v39 = vld [vmem:[#allocation2 + $0x8] sm:$0xff] }
0x1a0d   :  { %4405 = vmatmul.mubr.msk.f32.vlgmr.msra.gmra.mxu0 %vm70_vm0, %v3389_v39 }
0x1a0e   :  { %4419 = vmatpush3.msra.mxu0 %v4035_v14 }
0x1a0f   :  { %4420 = vmatprep.subr.mxu0 %v4034_v16 }
0x1a10   :  { %4421 = vmatpush3.msra.mxu0 %v4034_v16  ;;  %v4037_v16 = vld [vmem:[%s5296_s8 + $0x1] ss:$0 sm:$0xff] }
0x1a11   :  { %4422 = vmatprep.subr.mxu0 %v4033_v17 }
0x1a12   :  { %4423 = vmatpush3.msra.mxu0 %v4033_v17 }
0x1a13   :  { %4424 = vmatprep.subr.mxu0 %v4032_v18 }
0x1a14   :  { %4425 = vmatpush3.msra.mxu0 %v4032_v18 }
0x1a15   :  { %4426 = vmatprep.subr.mxu0 %v4031_v20 }
0x1a16   :  { %4427 = vmatpush3.msra.mxu0 %v4031_v20 }
0x1a17   :  { %4428 = vmatprep.subr.mxu0 %v4030_v21 }
0x1a18   :  { %4429 = vmatpush3.msra.mxu0 %v4030_v21 }
0x1a19   :  { %4430 = vmatprep.subr.mxu0 %v4029_v22 }
0x1a1a   :  { %4431 = vmatpush3.msra.mxu0 %v4029_v22 }
0x1a1b   :  { %4432 = vmatprep.subr.mxu0 %v4028_v10 }
0x1a1c   :  { %4433 = vmatpush3.msra.mxu0 %v4028_v10 }
0x1acd   :  { %v4406_v41 = vpop.f32.mrf.mxu0 }
0x1ace   :  { %v3481_v42 = vadd.f32 %v4406_v41, %v4013_v40 }
0x1acf   :  { %v3475_v43 = vpop.f32.mrf.mxu0 }
0x1ad0   :  { %v3485_v8 = vadd.f32 %v3481_v42, %v4997_v62  ;;  %v3476_v44 = vadd.f32 %v4013_v40, %v3475_v43 }
0x1ad2   :  { %v3493_v45 = vsel %vm70_vm0, %v3485_v8, 0.0  ;;  %v3484_v25 = vadd.f32 %v3476_v44, %v4995_v61  ;;  %v4023_v61 = vld [vmem:[%s5293_s5 + $0x38] sm:$0xff] }
0x1ad3   :  { %3494 = vadd.xlane.f32.xlu1 %v3493_v45  ;;  %4407 = vmatprep.subr.mxu1 %v4023_v61 }
0x1ad4   :  { %v3490_v23 = vsel %vm70_vm0, %v3484_v25, 0.0  ;;  %4408 = vmatpush3.msra.mxu1 %v4023_v61 }
0x1ad5   :  { %3491 = vadd.xlane.f32.xlu0 %v3490_v23  ;;  %4409 = vmatprep.subr.mxu1 %v4022_v53 }
0x1ad6   :  { %4410 = vmatpush3.msra.mxu1 %v4022_v53 }
0x1ad7   :  { %4411 = vmatprep.subr.mxu1 %v4021_v54 }
0x1ad8   :  { %4412 = vmatpush3.msra.mxu1 %v4021_v54 }
0x1ad9   :  { %4413 = vmatprep.subr.mxu1 %v4020_v55 }
0x1ada   :  { %4414 = vmatpush3.msra.mxu1 %v4020_v55 }
0x1b5c   :  { %v3495_v46 = vpop.xlane.xlu1 %3494 }
0x1b5d   :  { %v3497_v47 = vmul.f32 0.03125, %v3495_v46 }
0x1b5e   :  { %v3492_v48 = vpop.xlane.xlu0 %3491 }
0x1b5f   :  { %v3496_v15 = vmul.f32 0.03125, %v3492_v48  ;;  %v3499_v49 = vsub.f32 %v3485_v8, %v3497_v47 }
0x1b61   :  { %v3498_v4 = vsub.f32 %v3484_v25, %v3496_v15  ;;  %v3501_v52 = vmul.f32 %v3499_v49, %v3499_v49 }
0x1b63   :  { %v3500_v50 = vmul.f32 %v3498_v4, %v3498_v4  ;;  %v3505_v62 = vsel %vm70_vm0, %v3501_v52, 0.0 }
0x1b65   :  { %v3502_v51 = vsel %vm70_vm0, %v3500_v50, 0.0 }
0x1b66   :  { %3503 = vadd.xlane.f32.xlu0 %v3502_v51 }
0x1b6a   :  { %3506 = vadd.xlane.f32.xlu0 %v3505_v62 }
0x1bef   :  { %v3504_v13 = vpop.xlane.xlu0 %3503 }
0x1bf0   :  { %v3508_v56 = vmul.f32 0.03125, %v3504_v13 }
0x1bf2   :  { %v3510_v57 = vadd.f32 1e-05, %v3508_v56 }
0x1bf3   :  { %v3507_v58 = vpop.xlane.xlu0 %3506 }
0x1bf4   :  { %4546 = vrsqrt.f32 %v3510_v57  ;;  %v3509_v59 = vmul.f32 0.03125, %v3507_v58 }
0x1bf6   :  { %v3511_v60 = vadd.f32 1e-05, %v3509_v59 }
0x1bf8   :  { %4548 = vrsqrt.f32 %v3511_v60 }
0x1c01   :  { %v4547_v63 = vpop.eup %4546 }
0x1c02   :  { %v3514_v5 = vmul.f32 %v4547_v63, %v3498_v4 }
0x1c04   :  { %v3522_v3 = vmul.f32 %v4018_v6, %v3514_v5 }
0x1c05   :  { %v4549_v19 = vpop.eup %4548 }
0x1c06   :  { %v3515_v7 = vmul.f32 %v4549_v19, %v3499_v49  ;;  %v5215_v9 = vadd.f32 %v4019_v0, %v3522_v3 }
0x1c08   :  { %v3523_v12 = vmul.f32 %v4018_v6, %v3515_v7  ;;  %4415 = vmatprep.mubr.msk.f32.mxu1 %vm70_vm0, %v5215_v9 }
0x1c0a   :  { %v5219_v1 = vadd.f32 %v4019_v0, %v3523_v12 }
0x1c0c   :  { %4416 = vmatmul.mubr.msk.f32.vlgmr.msra.gmra.mxu1 %vm70_vm0, %v5219_v1 }
0x1ccc   :  { %v4417_v26 = vpop.f32.mrf.mxu1 }
0x1ccd   :  { %v3623_v27 = vadd.f32 %v4417_v26, %v4025_v24 }
0x1cce   :  { %v3617_v28 = vpop.f32.mrf.mxu1 }
0x1ccf   :  { %v3629_v29 = vmul.f32 0.70710677, %v3623_v27  ;;  %v3618_v2 = vadd.f32 %v4025_v24, %v3617_v28  ;;  %v3627_v7 = vmul.f32 0.5, %v3623_v27 }
0x1cd1   :  { %v3631_v30 = vand.u32 2147483647, %v3629_v29  ;;  %v3628_v31 = vmul.f32 0.70710677, %v3618_v2  ;;  %vm3671_vm10 = vcmp.ge.f32.partialorder %v3629_v29, 0.0  ;;  %v3626_v3 = vmul.f32 0.5, %v3618_v2 }
0x1cd3   :  { %v3633_v32 = vmul.f32 0.3275911, %v3631_v30  ;;  %v3630_v33 = vand.u32 2147483647, %v3628_v31  ;;  %v3659_v11 = vsub.f32 0.0, %v3631_v30  ;;  %vm3670_vm11 = vcmp.ge.f32.partialorder %v3628_v31, 0.0 }
0x1cd5   :  { %v3635_v34 = vadd.f32 1.0, %v3633_v32  ;;  %v3632_v35 = vmul.f32 0.3275911, %v3630_v33  ;;  %v3658_v37 = vsub.f32 0.0, %v3630_v33  ;;  %v3661_v38 = vmul.f32 %v3659_v11, %v3631_v30  ;;  %v3826_v11 = vld [vmem:[%s5301_s13] sm:$0xff] }
0x1cd7   :  { %4550 = vrcp.f32 %v3635_v34  ;;  %v3634_v36 = vadd.f32 1.0, %v3632_v35  ;;  %v3660_v40 = vmul.f32 %v3658_v37, %v3630_v33  ;;  %v3664_v42 = vmul.f32 1.442695, %v3661_v38  ;;  %v3828_v35 = vld [vmem:[%s5301_s13 + $0x10] sm:$0xff] }
0x1cd9   :  { %4552 = vrcp.f32 %v3634_v36  ;;  %v3662_v45 = vmul.f32 1.442695, %v3660_v40  ;;  %v3827_v36 = vld [vmem:[%s5301_s13 + $0x8] sm:$0xff] }
0x1cda   :  { %4554 = vpow2.f32 %v3664_v42 }
0x1cdb   :  { %4556 = vpow2.f32 %v3662_v45 }
0x1ce4   :  { %v4551_v39 = vpop.eup %4550 }
0x1ce5   :  { %v3641_v41 = vmul.f32 1.0614054, %v4551_v39 }
0x1ce6   :  { %v4553_v43 = vpop.eup %4552 }
0x1ce7   :  { %v3643_v8 = vadd.f32 -1.4531521, %v3641_v41  ;;  %v3640_v44 = vmul.f32 1.0614054, %v4553_v43  ;;  %v4555_v53 = vpop.eup %4554 }
0x1ce8   :  { %v4557_v56 = vpop.eup %4556 }
0x1ce9   :  { %v3645_v25 = vmul.f32 %v4551_v39, %v3643_v8  ;;  %v3642_v23 = vadd.f32 -1.4531521, %v3640_v44  ;;  %v4042_v8 = vld [vmem:[%s5299_s11 + $0x1] ss:$0 sm:$0xff]  ;;  %s4600_s11 = smov [#allocation3]  }
0x1cea   :  { %s3925_s3 = sshll.u32 %s4600_s11, 4  ;;  %s3926_s3 = int_to_ptr.vmem [resolvable:$true] %s3925_s3 }
0x1ceb   :  { %v3647_v46 = vadd.f32 1.4214138, %v3645_v25  ;;  %v3644_v47 = vmul.f32 %v4553_v43, %v3642_v23  ;;  %p4567_p1 = scmp.lt.s32.totalorder %s3926_s3, %s3926_s3 }
0x1ced   :  { %v3649_v48 = vmul.f32 %v4551_v39, %v3647_v46  ;;  %v3646_v15 = vadd.f32 1.4214138, %v3644_v47  ;;  %v4043_v46 = vld [vmem:[%s5300_s12 + $0x1] ss:$0 sm:$0xff]  ;;  %s4562_s12 = scalar_lea.vmem %s3926_s3, 256 }
0x1cee   :  { %p4563_p0 = scmp.ne.s32.totalorder %s3926_s3, %s4562_s12  ;;  %p4568_p2 = scmp.lt.s32.totalorder %s4562_s12, %s4562_s12 }
0x1cef   :  { %v3651_v49 = vadd.f32 -0.28449672, %v3649_v48  ;;  %v3648_v4 = vmul.f32 %v4553_v43, %v3646_v15 }
0x1cf0   :  { %p4569_p3 = por %p4568_p2, %p4567_p1 }
0x1cf1   :  { %v3653_v50 = vmul.f32 %v4551_v39, %v3651_v49  ;;  %v3650_v51 = vadd.f32 -0.28449672, %v3648_v4  ;;  %v4044_v49 = vld [vmem:[%s5302_s14] ss:$0 sm:$0xff] }
0x1cf2   :  { %p4570_p4 = pnand %p4569_p3, %p4563_p0 }
0x1cf3   :  { %v3655_v52 = vadd.f32 0.2548296, %v3653_v50  ;;  %v3652_v62 = vmul.f32 %v4553_v43, %v3650_v51 }
0x1cf5   :  { %v3657_v61 = vmul.f32 %v4551_v39, %v3655_v52  ;;  %v3654_v54 = vadd.f32 0.2548296, %v3652_v62 }
0x1cf7   :  { %v3667_v55 = vmul.f32 %v4555_v53, %v3657_v61  ;;  %v3656_v13 = vmul.f32 %v4553_v43, %v3654_v54 }
0x1cf9   :  { %v3669_v57 = vsub.f32 1.0, %v3667_v55  ;;  %v3666_v58 = vmul.f32 %v4557_v56, %v3656_v13 }
0x1cfb   :  { %v3673_v59 = vsub.f32 0.0, %v3669_v57  ;;  %v3668_v60 = vsub.f32 1.0, %v3666_v58 }
0x1cfd   :  { %v3675_v63 = vsel %vm3671_vm10, %v3669_v57, %v3673_v59  ;;  %v3672_v6 = vsub.f32 0.0, %v3668_v60 }
0x1cfe   :  { %v3677_v5 = vadd.f32 1.0, %v3675_v63 }
0x1cff   :  { %v3674_v0 = vsel %vm3670_vm11, %v3668_v60, %v3672_v6 }
0x1d00   :  { %v3676_v19 = vadd.f32 1.0, %v3674_v0  ;;  %v3679_v14 = vmul.f32 %v3677_v5, %v3627_v7 }
0x1d02   :  { %v3678_v12 = vmul.f32 %v3676_v19, %v3626_v3 }
0x1d04   :  { %4434 = vmatprep.mubr.msk.f32.mxu0 %vm1812_vm9, %v3678_v12 }
0x1d05   :  { %4435 = vmatmul.mubr.msk.f32.vlgmr.msra.gmra.mxu0 %vm1812_vm9, %v3679_v14 }
0x1dc5   :  { %v4436_v17 = vpop.f32.mrf.mxu0 }
0x1dc6   :  { %v3775_v18 = vadd.f32 %v4436_v17, %v4037_v16 }
0x1dc7   :  { %v3769_v20 = vpop.f32.mrf.mxu0 }
0x1dc8   :  { %v3770_v21 = vadd.f32 %v4037_v16, %v3769_v20  ;;  %v3779_v22 = vadd.f32 %v3775_v18, %v5219_v1 }
0x1dca   :  { %v3778_v10 = vadd.f32 %v3770_v21, %v5215_v9  ;;  %v3787_v24 = vsel %vm70_vm0, %v3779_v22, 0.0  ;;  %v3829_v9 = vld [vmem:[%s5301_s13 + $0x18] sm:$0xff] }
0x1dcb   :  { %3788 = vadd.xlane.f32.xlu0 %v3787_v24  ;;  %4437 = vmatprep.subr.mxu1 %v3829_v9 }
0x1dcc   :  { %v3784_v26 = vsel %vm70_vm0, %v3778_v10, 0.0  ;;  %4438 = vmatpush3.msra.mxu1 %v3829_v9 }
0x1dcd   :  { %3785 = vadd.xlane.f32.xlu1 %v3784_v26  ;;  %4439 = vmatprep.subr.mxu1 %v3828_v35 }
0x1dce   :  { %4440 = vmatpush3.msra.mxu1 %v3828_v35 }
0x1dcf   :  { %4441 = vmatprep.subr.mxu1 %v3827_v36 }
0x1dd0   :  { %4442 = vmatpush3.msra.mxu1 %v3827_v36 }
0x1dd1   :  { %4443 = vmatprep.subr.mxu1 %v3826_v11 }
0x1dd2   :  { %4444 = vmatpush3.msra.mxu1 %v3826_v11 }
0x1e54   :  { %v3789_v27 = vpop.xlane.xlu0 %3788 }
0x1e55   :  { %v3791_v28 = vmul.f32 0.03125, %v3789_v27 }
0x1e56   :  { %v3786_v29 = vpop.xlane.xlu1 %3785 }
0x1e57   :  { %v3793_v2 = vsub.f32 %v3779_v22, %v3791_v28  ;;  %v3790_v30 = vmul.f32 0.03125, %v3786_v29 }
0x1e59   :  { %v3792_v31 = vsub.f32 %v3778_v10, %v3790_v30  ;;  %v3795_v32 = vmul.f32 %v3793_v2, %v3793_v2 }
0x1e5b   :  { %v3799_v33 = vsel %vm70_vm0, %v3795_v32, 0.0  ;;  %v3794_v34 = vmul.f32 %v3792_v31, %v3792_v31 }
0x1e5c   :  { %3800 = vadd.xlane.f32.xlu0 %v3799_v33 }
0x1e5d   :  { %v3796_v1 = vsel %vm70_vm0, %v3794_v34, 0.0 }
0x1e5e   :  { %3797 = vadd.xlane.f32.xlu1 %v3796_v1 }
0x1ee5   :  { %v3801_v37 = vpop.xlane.xlu0 %3800 }
0x1ee6   :  { %v3803_v38 = vmul.f32 0.03125, %v3801_v37 }
0x1ee7   :  { %v3798_v39 = vpop.xlane.xlu1 %3797 }
0x1ee8   :  { %v3805_v40 = vadd.f32 1e-05, %v3803_v38  ;;  %v3802_v41 = vmul.f32 0.03125, %v3798_v39 }
0x1eea   :  { %4558 = vrsqrt.f32 %v3805_v40  ;;  %v3804_v42 = vadd.f32 1e-05, %v3802_v41 }
0x1eec   :  { %4560 = vrsqrt.f32 %v3804_v42 }
0x1ef7   :  { %v4559_v43 = vpop.eup %4558 }
0x1ef8   :  { %v3809_v44 = vmul.f32 %v4559_v43, %v3793_v2 }
0x1ef9   :  { %v4561_v45 = vpop.eup %4560 }
0x1efa   :  { %v3808_v25 = vmul.f32 %v4561_v45, %v3792_v31  ;;  %v3817_v23 = vmul.f32 %v4042_v8, %v3809_v44 }
0x1efc   :  { %v3816_v47 = vmul.f32 %v4042_v8, %v3808_v25  ;;  %v3825_v15 = vadd.f32 %v4043_v46, %v3817_v23 }
0x1efe   :  { %v3824_v48 = vadd.f32 %v4043_v46, %v3816_v47 }
0x1f00   :  { %4445 = vmatprep.mubr.msk.f32.mxu1 %vm70_vm0, %v3824_v48 }
0x1f01   :  { %4446 = vmatmul.mubr.msk.f32.vlgmr.msra.gmra.mxu1 %vm70_vm0, %v3825_v15 }
0x1fc1   :  { %v4447_v4 = vpop.f32.mrf.mxu1 }
0x1fc2   :  { %v3915_v50 = vadd.f32 %v4447_v4, %v4044_v49 }
0x1fc3   :  { %v3909_v51 = vpop.f32.mrf.mxu1 }
0x1fc4   :  { %3919 = vst [vmem:[#allocation3 + $0x8] sm:$0xff] %v3915_v50  ;;  %v3910_v52 = vadd.f32 %v4044_v49, %v3909_v51 }
0x1fc6   :  { %3918 = vst [vmem:[#allocation3] sm:$0xff] %v3910_v52 }
0x1fc7   :  { %4573 = shalt.err (!%p4570_p4)
}
0x1fc8   :  { %s4601_s27 = smov 128  }
0x1fc9   :  { %3931 = dma.vmem_to_hbm [thread:$0]  %s3926_s3, 256, %s5303_s15, [#allocation4], %s4601_s27, %s4601_s27, %s5320_s19  }
0x1fca   :  { %4582 = dma.done.wait [#allocation4], 256  }
0x1fcb   :  { %4583 = vsyncadd [#allocation4], 4294967040 }
0x1fcc   :  { %3935 = vsyncpa [#allocation4], 1 }

</bundles_post_ra>
